<compile_context>
chip_gen: v7x
topology: tpu7x:2x2x1
jax: 0.10.0
libtpu: 0.0.40
codegen_flags: <defaults>
</compile_context>

<pallas_src>
import functools

import numpy as np

import jax
import jax.numpy as jnp
from jax import lax
from jax.experimental import pallas as pl
from jax.experimental.pallas import tpu as pltpu

_BN_EPS = 1e-5


def _round_up(x, m):
    return (x + m - 1) // m * m


# ----------------------------------------------------------------------------
# Pallas kernel: one conv-layer head  y = act(BN(W @ cols) * scale + shift)
#   cols_ref : [K_pad, M_pad] bf16  patch matrix (padded cols are exact zeros)
#   w_ref    : [R, K_pad]     bf16  weights, R = n_chunks * cout, parity-major
#   p_ref    : [R, 2]         f32   per-row (scale, shift)
#   o_ref    : [R, M_pad]           lane-dense output
# ----------------------------------------------------------------------------
def _matmul_bn_act_kernel(cols_ref, w_ref, p_ref, o_ref, *,
                          cout, n_chunks, m_real, use_bn, act):
    z = jnp.dot(w_ref[...], cols_ref[...],
                preferred_element_type=jnp.float32)            # MXU, [R, M_pad]

    def _act(v):
        if act == "relu":
            return jnp.maximum(v, 0.0)
        if act == "sigmoid":
            return jax.nn.sigmoid(v)
        return v

    if use_bn and n_chunks > 1:
        # Exact batch stats pooled per channel over the n_chunks parity
        # row-blocks (aligned static row slices), then block-wise epilogue.
        inv = 1.0 / float(n_chunks * m_real)
        s1 = jnp.zeros((cout, 1), jnp.float32)
        s2 = jnp.zeros((cout, 1), jnp.float32)
        for c in range(n_chunks):
            blk = z[c * cout:(c + 1) * cout, :]
            s1 = s1 + jnp.sum(blk, axis=1, keepdims=True)
            s2 = s2 + jnp.sum(blk * blk, axis=1, keepdims=True)
        mean = s1 * inv
        var = jnp.maximum(s2 * inv - mean * mean, 0.0)         # cancellation guard
        rstd = jax.lax.rsqrt(var + _BN_EPS)
        for c in range(n_chunks):
            lo, hi = c * cout, (c + 1) * cout
            blk = (z[lo:hi, :] - mean) * rstd
            blk = blk * p_ref[lo:hi, 0:1] + p_ref[lo:hi, 1:2]
            o_ref[lo:hi, :] = _act(blk).astype(o_ref.dtype)
    else:
        if use_bn:
            inv = 1.0 / float(m_real)
            mean = jnp.sum(z, axis=1, keepdims=True) * inv
            var = jnp.maximum(jnp.sum(z * z, axis=1, keepdims=True) * inv
                              - mean * mean, 0.0)
            z = (z - mean) * jax.lax.rsqrt(var + _BN_EPS)
        z = z * p_ref[:, 0:1] + p_ref[:, 1:2]
        o_ref[...] = _act(z).astype(o_ref.dtype)


def _layer_head(cols, w2d, p2, *, cout, n_chunks, m_real, use_bn, act, out_dtype):
    K_pad, M_pad = cols.shape
    R = w2d.shape[0]
    # Single lane-dense tile per layer (grid of one step) — see large-batch TODO.
    vmem_bytes = 2 * (cols.size * 2 + w2d.size * 2 + p2.size * 4
                      + R * M_pad * jnp.dtype(out_dtype).itemsize)
    assert vmem_bytes < 8 * 1024 * 1024, (
        "layer exceeds the single-tile path; add M tiling + two-pass BN")
    kern = functools.partial(_matmul_bn_act_kernel, cout=cout, n_chunks=n_chunks,
                             m_real=m_real, use_bn=use_bn, act=act)
    return pl.pallas_call(
        kern,
        out_shape=jax.ShapeDtypeStruct((R, M_pad), out_dtype),
        grid=(1,),
        in_specs=[
            pl.BlockSpec((K_pad, M_pad), lambda i: (0, 0)),    # patch matrix
            pl.BlockSpec((R, K_pad), lambda i: (0, 0)),        # weights
            pl.BlockSpec((R, 2), lambda i: (0, 0)),            # (scale, shift)
        ],
        out_specs=pl.BlockSpec((R, M_pad), lambda i: (0, 0)),
        compiler_params=pltpu.CompilerParams(
            dimension_semantics=("arbitrary",)),
    )(cols, w2d, p2)


def _scale_shift(b, gamma, beta, use_bn):
    if use_bn:
        # Conv bias cancels exactly against the batch-mean subtraction.
        return jnp.stack([gamma, beta], axis=1).astype(jnp.float32)
    return jnp.stack([jnp.ones_like(b), b], axis=1).astype(jnp.float32)


# ----------------------------------------------------------------------------
# XLA-side glue: patch-matrix assembly (see TODO on in-kernel im2col)
# ----------------------------------------------------------------------------
def conv2d(x_cbhw, w, b, gamma, beta, *, stride, pad, use_bn, act, out_dtype):
    """Standard Conv2d; x: [Cin, B, H, W], w: [Cout, Cin, kh, kw] (PyTorch)."""
    C, B, H, W = x_cbhw.shape
    Cout, Cin, kh, kw = w.shape
    assert Cin == C
    Ho = (H + 2 * pad - kh) // stride + 1
    Wo = (W + 2 * pad - kw) // stride + 1
    M = B * Ho * Wo
    M_pad = _round_up(M, 128)                 # 128-lane granule only (no tile waste)
    K = kh * kw * C
    K_pad = _round_up(K, 16)                  # bf16 sublane packing

    xp = jnp.pad(x_cbhw, ((0, 0), (0, 0), (pad, pad), (pad, pad)))
    taps = [xp[:, :, i:i + (Ho - 1) * stride + 1:stride,
                    j:j + (Wo - 1) * stride + 1:stride]
            for i in range(kh) for j in range(kw)]             # each [C,B,Ho,Wo]
    cols = jnp.stack(taps, axis=0).reshape(K, M).astype(jnp.bfloat16)
    cols = jnp.pad(cols, ((0, K_pad - K), (0, M_pad - M)))

    w2d = w.transpose(0, 2, 3, 1).reshape(Cout, K).astype(jnp.bfloat16)
    w2d = jnp.pad(w2d, ((0, 0), (0, K_pad - K)))

    p2 = _scale_shift(b, gamma, beta, use_bn)                  # [Cout, 2]

    y = _layer_head(cols, w2d, p2, cout=Cout, n_chunks=1, m_real=M,
                    use_bn=use_bn, act=act, out_dtype=out_dtype)
    return y[:, :M].reshape(Cout, B, Ho, Wo)


def conv_transpose2d_s2(x_cbhw, w_t, b, gamma, beta, *, use_bn, act, out_dtype):
    """ConvTranspose2d(kernel=4, stride=2, padding=1) via sub-pixel decomposition.

    One 3x3 "union window" patch matrix over the UN-dilated input; the four
    output-parity 2x2 sub-kernels are stacked along the output-row axis.
    """
    Cin, B, H, W = x_cbhw.shape
    _, Cout, kh, kw = w_t.shape
    assert kh == 4 and kw == 4
    M = B * H * W
    M_pad = _round_up(M, 128)
    K = 9 * Cin
    K_pad = _round_up(K, 16)

    xp = jnp.pad(x_cbhw, ((0, 0), (0, 0), (1, 1), (1, 1)))
    taps = [xp[:, :, dy:dy + H, dx:dx + W] for dy in range(3) for dx in range(3)]
    cols = jnp.stack(taps, axis=0).reshape(K, M).astype(jnp.bfloat16)
    cols = jnp.pad(cols, ((0, K_pad - K), (0, M_pad - M)))

    # Parity-major stacked sub-kernels embedded in the shared 3x3 union window:
    # output pixel (2m+py, 2n+px) uses xp[m+dy, n+dx] * w_t[ky, kx] with
    # ky = 3 + py - 2*dy, kx = 3 + px - 2*dx (zero weight when out of range).
    rows = []
    for py in range(2):
        for px in range(2):
            t = []
            for dy in range(3):
                for dx in range(3):
                    ky = 3 + py - 2 * dy
                    kx = 3 + px - 2 * dx
                    if 0 <= ky < 4 and 0 <= kx < 4:
                        t.append(w_t[:, :, ky, kx])            # [Cin, Cout]
                    else:
                        t.append(jnp.zeros((Cin, Cout), w_t.dtype))
            w_sub = jnp.stack(t, axis=0)                       # [9, Cin, Cout]
            rows.append(jnp.transpose(w_sub, (2, 0, 1)).reshape(Cout, K))
    w2d = jnp.concatenate(rows, axis=0).astype(jnp.bfloat16)   # [4*Cout, K]
    w2d = jnp.pad(w2d, ((0, 0), (0, K_pad - K)))

    p2 = jnp.tile(_scale_shift(b, gamma, beta, use_bn), (4, 1))  # [4*Cout, 2]

    y = _layer_head(cols, w2d, p2, cout=Cout, n_chunks=4, m_real=M,
                    use_bn=use_bn, act=act, out_dtype=out_dtype)  # [4*Cout, M_pad]
    y = y[:, :M].reshape(2, 2, Cout, B, H, W)                  # [py, px, co, b, m, n]
    y = jnp.transpose(y, (2, 3, 4, 0, 5, 1)).reshape(Cout, B, 2 * H, 2 * W)
    return y


# ----------------------------------------------------------------------------
# Parameters (deterministic synthetic init, PyTorch layouts) and forward
# ----------------------------------------------------------------------------
def init_params(key):
    ks = jax.random.split(key, 20)

    def w_init(k, shape):
        fan = shape[1] * shape[2] * shape[3]
        return jax.random.normal(k, shape, jnp.float32) / jnp.sqrt(float(fan))

    def b_init(k, n):
        return 0.01 * jax.random.normal(k, (n,), jnp.float32)

    def g_init(k, n):
        return 1.0 + 0.1 * jax.random.normal(k, (n,), jnp.float32)

    def be_init(k, n):
        return 0.05 * jax.random.normal(k, (n,), jnp.float32)

    return {
        # encoder (Conv2d weights: [Cout, Cin, kh, kw])
        "e1_w": w_init(ks[0], (16, 1, 4, 4)), "e1_b": b_init(ks[1], 16),
        "bn1_g": g_init(ks[2], 16), "bn1_b": be_init(ks[3], 16),
        "e2_w": w_init(ks[4], (8, 16, 4, 4)), "e2_b": b_init(ks[5], 8),
        "bn2_g": g_init(ks[6], 8), "bn2_b": be_init(ks[7], 8),
        "e3_w": w_init(ks[8], (1, 8, 3, 3)), "e3_b": b_init(ks[9], 1),
        # decoder (ConvTranspose2d weights: [Cin, Cout, kh, kw])
        "d1_w": w_init(ks[10], (1, 8, 3, 3)), "d1_b": b_init(ks[11], 8),
        "bn3_g": g_init(ks[12], 8), "bn3_b": be_init(ks[13], 8),
        "d2_w": w_init(ks[14], (8, 16, 4, 4)), "d2_b": b_init(ks[15], 16),
        "bn4_g": g_init(ks[16], 16), "bn4_b": be_init(ks[17], 16),
        "d3_w": w_init(ks[18], (16, 1, 4, 4)), "d3_b": b_init(ks[19], 1),
    }


def autoencoder_forward(params, x, stop=False):
    p = params
    # NCHW -> channel-first [C, B, H, W]; bf16 between layers.
    h = jnp.transpose(x, (1, 0, 2, 3)).astype(jnp.bfloat16)          # [1,B,28,28]
    # ---- encoder ----
    h = conv2d(h, p["e1_w"], p["e1_b"], p["bn1_g"], p["bn1_b"], stride=2, pad=1,
               use_bn=True, act="relu", out_dtype=jnp.bfloat16)      # [16,B,14,14]
    h = conv2d(h, p["e2_w"], p["e2_b"], p["bn2_g"], p["bn2_b"], stride=2, pad=1,
               use_bn=True, act="relu", out_dtype=jnp.bfloat16)      # [8,B,7,7]
    h = conv2d(h, p["e3_w"], p["e3_b"], None, None, stride=1, pad=1,
               use_bn=False, act="relu", out_dtype=jnp.float32)      # [1,B,7,7]
    if stop:
        return jnp.transpose(h, (1, 0, 2, 3)).reshape(h.shape[1], -1)  # [B, 49]
    # ---- decoder ----
    # d1: ConvTranspose2d(1,8,3,1,1) == Conv2d with flipped kernel, swapped
    #     channel axes, pad = k-1-p = 1 (stride 1, no dilation needed).
    w_d1 = jnp.transpose(p["d1_w"][:, :, ::-1, ::-1], (1, 0, 2, 3))  # [8,1,3,3]
    h = conv2d(h, w_d1, p["d1_b"], p["bn3_g"], p["bn3_b"], stride=1, pad=1,
               use_bn=True, act="relu", out_dtype=jnp.bfloat16)      # [8,B,7,7]
    h = conv_transpose2d_s2(h, p["d2_w"], p["d2_b"], p["bn4_g"], p["bn4_b"],
                            use_bn=True, act="relu",
                            out_dtype=jnp.bfloat16)                  # [16,B,14,14]
    h = conv_transpose2d_s2(h, p["d3_w"], p["d3_b"], None, None,
                            use_bn=False, act="sigmoid",
                            out_dtype=jnp.float32)                   # [1,B,28,28]
    return jnp.transpose(h, (1, 0, 2, 3))                            # back to NCHW


# ----------------------------------------------------------------------------
# Pure-XLA reference with the same bf16 operand rounding (correctness check)
# ----------------------------------------------------------------------------
def reference_forward(params, x, stop=False):
    p = params

    def conv(h, w, b, s, pd):
        y = lax.conv_general_dilated(
            h.astype(jnp.bfloat16), w.astype(jnp.bfloat16), (s, s),
            [(pd, pd), (pd, pd)], dimension_numbers=("NCHW", "OIHW", "NCHW"),
            preferred_element_type=jnp.float32)
        return y + b[None, :, None, None]

    def convt(h, w_t, b, s, pd):
        k = w_t.shape[2]
        w = jnp.transpose(w_t[:, :, ::-1, ::-1], (1, 0, 2, 3))
        y = lax.conv_general_dilated(
            h.astype(jnp.bfloat16), w.astype(jnp.bfloat16), (1, 1),
            [(k - 1 - pd, k - 1 - pd)] * 2, lhs_dilation=(s, s),
            dimension_numbers=("NCHW", "OIHW", "NCHW"),
            preferred_element_type=jnp.float32)
        return y + b[None, :, None, None]

    def bn(y, g, be):
        m = jnp.mean(y, axis=(0, 2, 3), keepdims=True)
        v = jnp.mean((y - m) ** 2, axis=(0, 2, 3), keepdims=True)
        return ((y - m) * lax.rsqrt(v + _BN_EPS) * g[None, :, None, None]
                + be[None, :, None, None])

    h = x
    h = jnp.maximum(bn(conv(h, p["e1_w"], p["e1_b"], 2, 1),
                       p["bn1_g"], p["bn1_b"]), 0).astype(jnp.bfloat16)
    h = jnp.maximum(bn(conv(h, p["e2_w"], p["e2_b"], 2, 1),
                       p["bn2_g"], p["bn2_b"]), 0).astype(jnp.bfloat16)
    h = jnp.maximum(conv(h, p["e3_w"], p["e3_b"], 1, 1), 0)          # f32
    if stop:
        return h.reshape(h.shape[0], -1)
    h = jnp.maximum(bn(convt(h, p["d1_w"], p["d1_b"], 1, 1),
                       p["bn3_g"], p["bn3_b"]), 0).astype(jnp.bfloat16)
    h = jnp.maximum(bn(convt(h, p["d2_w"], p["d2_b"], 2, 1),
                       p["bn4_g"], p["bn4_b"]), 0).astype(jnp.bfloat16)
    h = jax.nn.sigmoid(convt(h, p["d3_w"], p["d3_b"], 2, 1))
    return h


if __name__ == "__main__":
    key = jax.random.PRNGKey(0)
    pkey, xkey = jax.random.split(key)
    params = init_params(pkey)

    # Fashion-MNIST-shaped input: batch=2, 1 channel, 28x28 (NCHW, like PyTorch)
    x = jax.random.normal(xkey, (2, 1, 28, 28), jnp.float32)

    fwd = jax.jit(functools.partial(autoencoder_forward, stop=False))
    y = jax.block_until_ready(fwd(params, x))
    assert y.shape == (2, 1, 28, 28), y.shape
    assert bool(jnp.all(jnp.isfinite(y)))
    assert bool(jnp.all((y >= 0.0) & (y <= 1.0)))   # sigmoid output range

    enc = jax.jit(functools.partial(autoencoder_forward, stop=True))
    z = jax.block_until_ready(enc(params, x))
    assert z.shape == (2, 7 * 7), z.shape
    assert bool(jnp.all(jnp.isfinite(z)))

    # Numerical check against the pure-XLA reference (same bf16 operand rounding;
    # loose tolerance absorbs bf16 rounding-boundary / accumulation-order drift).
    y_ref = reference_forward(params, x, stop=False)
    z_ref = reference_forward(params, x, stop=True)
    np.testing.assert_allclose(np.asarray(y, np.float32),
                               np.asarray(y_ref, np.float32),
                               rtol=5e-2, atol=5e-2)
    np.testing.assert_allclose(np.asarray(z, np.float32),
                               np.asarray(z_ref, np.float32),
                               rtol=5e-2, atol=5e-2)

    print("KERNEL_OK")
</pallas_src>

<mosaic_0001>
module attributes {stable_mosaic.version = 11 : i64} {
  func.func @_matmul_bn_act_kernel(%arg0: i32, %arg1: memref<16x512xbf16, #tpu.memory_space<vmem>>, %arg2: memref<16x16xbf16, #tpu.memory_space<vmem>>, %arg3: memref<16x2xf32, #tpu.memory_space<vmem>>, %arg4: memref<16x512xbf16, #tpu.memory_space<vmem>>) attributes {dimension_semantics = [#tpu.dimension_semantics<arbitrary>], iteration_bounds = array<i64: 1>, scalar_prefetch = 0 : i64, scratch_operands = 0 : i64, tpu.core_type = #tpu.core_type<tc>, window_params = [{pipeline_mode = #tpu.pipeline_mode<synchronous>, transform_indices = @transform_0, window_bounds = array<i64: 16, 512>}, {pipeline_mode = #tpu.pipeline_mode<synchronous>, transform_indices = @transform_1, window_bounds = array<i64: 16, 16>}, {pipeline_mode = #tpu.pipeline_mode<synchronous>, transform_indices = @transform_2, window_bounds = array<i64: 16, 2>}, {pipeline_mode = #tpu.pipeline_mode<synchronous>, transform_indices = @transform_3, window_bounds = array<i64: 16, 512>}]} {
    %c0 = arith.constant 0 : index
    %c0_0 = arith.constant 0 : index
    %0 = vector.load %arg2[%c0, %c0_0] : memref<16x16xbf16, #tpu.memory_space<vmem>>, vector<16x16xbf16>
    %c0_1 = arith.constant 0 : index
    %c0_2 = arith.constant 0 : index
    %1 = vector.load %arg1[%c0_1, %c0_2] : memref<16x512xbf16, #tpu.memory_space<vmem>>, vector<16x512xbf16>
    %cst = arith.constant dense<0.000000e+00> : vector<16x512xf32>
    %2 = tpu.matmul %0, %1, %cst {dimension_numbers = #tpu.dot_dimension_numbers<[1], [0], [0], [1], [0, 0, 1, 1], [], []>} : vector<16x16xbf16>, vector<16x512xbf16>, vector<16x512xf32> -> vector<16x512xf32>
    %cst_3 = arith.constant dense<0.000000e+00> : vector<16xf32>
    %3 = vector.multi_reduction <add>, %2, %cst_3 [1] : vector<16x512xf32> to vector<16xf32>
    %4 = vector.shape_cast %3 : vector<16xf32> to vector<16x1xf32>
    %cst_4 = arith.constant 0.00255102036 : f32
    %5 = vector.broadcast %cst_4 : f32 to vector<16x1xf32>
    %6 = arith.mulf %4, %5 : vector<16x1xf32>
    %7 = arith.mulf %2, %2 : vector<16x512xf32>
    %cst_5 = arith.constant dense<0.000000e+00> : vector<16xf32>
    %8 = vector.multi_reduction <add>, %7, %cst_5 [1] : vector<16x512xf32> to vector<16xf32>
    %9 = vector.shape_cast %8 : vector<16xf32> to vector<16x1xf32>
    %cst_6 = arith.constant 0.00255102036 : f32
    %10 = vector.broadcast %cst_6 : f32 to vector<16x1xf32>
    %11 = arith.mulf %9, %10 : vector<16x1xf32>
    %12 = arith.mulf %6, %6 : vector<16x1xf32>
    %13 = arith.subf %11, %12 : vector<16x1xf32>
    %cst_7 = arith.constant 0.000000e+00 : f32
    %14 = vector.broadcast %cst_7 : f32 to vector<16x1xf32>
    %15 = arith.maximumf %13, %14 : vector<16x1xf32>
    %16 = vector.broadcast %6 : vector<16x1xf32> to vector<16x512xf32>
    %17 = arith.subf %2, %16 : vector<16x512xf32>
    %cst_8 = arith.constant 9.99999974E-6 : f32
    %18 = vector.broadcast %cst_8 : f32 to vector<16x1xf32>
    %19 = arith.addf %15, %18 : vector<16x1xf32>
    %20 = math.rsqrt %19 : vector<16x1xf32>
    %21 = vector.broadcast %20 : vector<16x1xf32> to vector<16x512xf32>
    %22 = arith.mulf %17, %21 : vector<16x512xf32>
    %c0_9 = arith.constant 0 : index
    %c0_10 = arith.constant 0 : index
    %23 = vector.load %arg3[%c0_9, %c0_10] : memref<16x2xf32, #tpu.memory_space<vmem>>, vector<16x1xf32>
    %24 = vector.broadcast %23 : vector<16x1xf32> to vector<16x512xf32>
    %25 = arith.mulf %22, %24 : vector<16x512xf32>
    %c0_11 = arith.constant 0 : index
    %c1 = arith.constant 1 : index
    %26 = vector.load %arg3[%c0_11, %c1] : memref<16x2xf32, #tpu.memory_space<vmem>>, vector<16x1xf32>
    %27 = vector.broadcast %26 : vector<16x1xf32> to vector<16x512xf32>
    %28 = arith.addf %25, %27 : vector<16x512xf32>
    %cst_12 = arith.constant 0.000000e+00 : f32
    %29 = vector.broadcast %cst_12 : f32 to vector<16x512xf32>
    %30 = arith.maximumf %28, %29 : vector<16x512xf32>
    %31 = arith.truncf %30 : vector<16x512xf32> to vector<16x512xbf16>
    %c0_13 = arith.constant 0 : index
    %c0_14 = arith.constant 0 : index
    %32 = vector.load %arg4[%c0_13, %c0_14] : memref<16x512xbf16, #tpu.memory_space<vmem>>, vector<16x512xbf16>
    tpu.vector_store %arg4[%c0_13, %c0_14], %31 {strides = array<i32>} : memref<16x512xbf16, #tpu.memory_space<vmem>>, vector<16x512xbf16>,
    return
  }
  func.func @transform_0(%arg0: i32) -> (i32, i32) {
    %c0_i32 = arith.constant 0 : i32
    %c0_i32_0 = arith.constant 0 : i32
    %c0_i32_1 = arith.constant 0 : i32
    return %c0_i32, %c0_i32_0 : i32, i32
  }
  func.func @transform_1(%arg0: i32) -> (i32, i32) {
    %c0_i32 = arith.constant 0 : i32
    %c0_i32_0 = arith.constant 0 : i32
    %c0_i32_1 = arith.constant 0 : i32
    return %c0_i32, %c0_i32_0 : i32, i32
  }
  func.func @transform_2(%arg0: i32) -> (i32, i32) {
    %c0_i32 = arith.constant 0 : i32
    %c0_i32_0 = arith.constant 0 : i32
    %c0_i32_1 = arith.constant 0 : i32
    return %c0_i32, %c0_i32_0 : i32, i32
  }
  func.func @transform_3(%arg0: i32) -> (i32, i32) {
    %c0_i32 = arith.constant 0 : i32
    %c0_i32_0 = arith.constant 0 : i32
    %c0_i32_1 = arith.constant 0 : i32
    return %c0_i32, %c0_i32_0 : i32, i32
  }
}

module attributes {stable_mosaic.version = 11 : i64} {
  func.func @_matmul_bn_act_kernel(%arg0: i32, %arg1: memref<256x128xbf16, #tpu.memory_space<vmem>>, %arg2: memref<8x256xbf16, #tpu.memory_space<vmem>>, %arg3: memref<8x2xf32, #tpu.memory_space<vmem>>, %arg4: memref<8x128xbf16, #tpu.memory_space<vmem>>) attributes {dimension_semantics = [#tpu.dimension_semantics<arbitrary>], iteration_bounds = array<i64: 1>, scalar_prefetch = 0 : i64, scratch_operands = 0 : i64, tpu.core_type = #tpu.core_type<tc>, window_params = [{pipeline_mode = #tpu.pipeline_mode<synchronous>, transform_indices = @transform_0, window_bounds = array<i64: 256, 128>}, {pipeline_mode = #tpu.pipeline_mode<synchronous>, transform_indices = @transform_1, window_bounds = array<i64: 8, 256>}, {pipeline_mode = #tpu.pipeline_mode<synchronous>, transform_indices = @transform_2, window_bounds = array<i64: 8, 2>}, {pipeline_mode = #tpu.pipeline_mode<synchronous>, transform_indices = @transform_3, window_bounds = array<i64: 8, 128>}]} {
    %c0 = arith.constant 0 : index
    %c0_0 = arith.constant 0 : index
    %0 = vector.load %arg2[%c0, %c0_0] : memref<8x256xbf16, #tpu.memory_space<vmem>>, vector<8x256xbf16>
    %c0_1 = arith.constant 0 : index
    %c0_2 = arith.constant 0 : index
    %1 = vector.load %arg1[%c0_1, %c0_2] : memref<256x128xbf16, #tpu.memory_space<vmem>>, vector<256x128xbf16>
    %cst = arith.constant dense<0.000000e+00> : vector<8x128xf32>
    %2 = tpu.matmul %0, %1, %cst {dimension_numbers = #tpu.dot_dimension_numbers<[1], [0], [0], [1], [0, 0, 1, 1], [], []>} : vector<8x256xbf16>, vector<256x128xbf16>, vector<8x128xf32> -> vector<8x128xf32>
    %cst_3 = arith.constant dense<0.000000e+00> : vector<8xf32>
    %3 = vector.multi_reduction <add>, %2, %cst_3 [1] : vector<8x128xf32> to vector<8xf32>
    %4 = vector.shape_cast %3 : vector<8xf32> to vector<8x1xf32>
    %cst_4 = arith.constant 0.0102040814 : f32
    %5 = vector.broadcast %cst_4 : f32 to vector<8x1xf32>
    %6 = arith.mulf %4, %5 : vector<8x1xf32>
    %7 = arith.mulf %2, %2 : vector<8x128xf32>
    %cst_5 = arith.constant dense<0.000000e+00> : vector<8xf32>
    %8 = vector.multi_reduction <add>, %7, %cst_5 [1] : vector<8x128xf32> to vector<8xf32>
    %9 = vector.shape_cast %8 : vector<8xf32> to vector<8x1xf32>
    %cst_6 = arith.constant 0.0102040814 : f32
    %10 = vector.broadcast %cst_6 : f32 to vector<8x1xf32>
    %11 = arith.mulf %9, %10 : vector<8x1xf32>
    %12 = arith.mulf %6, %6 : vector<8x1xf32>
    %13 = arith.subf %11, %12 : vector<8x1xf32>
    %cst_7 = arith.constant 0.000000e+00 : f32
    %14 = vector.broadcast %cst_7 : f32 to vector<8x1xf32>
    %15 = arith.maximumf %13, %14 : vector<8x1xf32>
    %16 = vector.broadcast %6 : vector<8x1xf32> to vector<8x128xf32>
    %17 = arith.subf %2, %16 : vector<8x128xf32>
    %cst_8 = arith.constant 9.99999974E-6 : f32
    %18 = vector.broadcast %cst_8 : f32 to vector<8x1xf32>
    %19 = arith.addf %15, %18 : vector<8x1xf32>
    %20 = math.rsqrt %19 : vector<8x1xf32>
    %21 = vector.broadcast %20 : vector<8x1xf32> to vector<8x128xf32>
    %22 = arith.mulf %17, %21 : vector<8x128xf32>
    %c0_9 = arith.constant 0 : index
    %c0_10 = arith.constant 0 : index
    %23 = vector.load %arg3[%c0_9, %c0_10] : memref<8x2xf32, #tpu.memory_space<vmem>>, vector<8x1xf32>
    %24 = vector.broadcast %23 : vector<8x1xf32> to vector<8x128xf32>
    %25 = arith.mulf %22, %24 : vector<8x128xf32>
    %c0_11 = arith.constant 0 : index
    %c1 = arith.constant 1 : index
    %26 = vector.load %arg3[%c0_11, %c1] : memref<8x2xf32, #tpu.memory_space<vmem>>, vector<8x1xf32>
    %27 = vector.broadcast %26 : vector<8x1xf32> to vector<8x128xf32>
    %28 = arith.addf %25, %27 : vector<8x128xf32>
    %cst_12 = arith.constant 0.000000e+00 : f32
    %29 = vector.broadcast %cst_12 : f32 to vector<8x128xf32>
    %30 = arith.maximumf %28, %29 : vector<8x128xf32>
    %31 = arith.truncf %30 : vector<8x128xf32> to vector<8x128xbf16>
    %c0_13 = arith.constant 0 : index
    %c0_14 = arith.constant 0 : index
    %32 = vector.load %arg4[%c0_13, %c0_14] : memref<8x128xbf16, #tpu.memory_space<vmem>>, vector<8x128xbf16>
    tpu.vector_store %arg4[%c0_13, %c0_14], %31 {strides = array<i32>} : memref<8x128xbf16, #tpu.memory_space<vmem>>, vector<8x128xbf16>,
    return
  }
  func.func @transform_0(%arg0: i32) -> (i32, i32) {
    %c0_i32 = arith.constant 0 : i32
    %c0_i32_0 = arith.constant 0 : i32
    %c0_i32_1 = arith.constant 0 : i32
    return %c0_i32, %c0_i32_0 : i32, i32
  }
  func.func @transform_1(%arg0: i32) -> (i32, i32) {
    %c0_i32 = arith.constant 0 : i32
    %c0_i32_0 = arith.constant 0 : i32
    %c0_i32_1 = arith.constant 0 : i32
    return %c0_i32, %c0_i32_0 : i32, i32
  }
  func.func @transform_2(%arg0: i32) -> (i32, i32) {
    %c0_i32 = arith.constant 0 : i32
    %c0_i32_0 = arith.constant 0 : i32
    %c0_i32_1 = arith.constant 0 : i32
    return %c0_i32, %c0_i32_0 : i32, i32
  }
  func.func @transform_3(%arg0: i32) -> (i32, i32) {
    %c0_i32 = arith.constant 0 : i32
    %c0_i32_0 = arith.constant 0 : i32
    %c0_i32_1 = arith.constant 0 : i32
    return %c0_i32, %c0_i32_0 : i32, i32
  }
}

module attributes {stable_mosaic.version = 11 : i64} {
  func.func @_matmul_bn_act_kernel(%arg0: i32, %arg1: memref<80x128xbf16, #tpu.memory_space<vmem>>, %arg2: memref<1x80xbf16, #tpu.memory_space<vmem>>, %arg3: memref<1x2xf32, #tpu.memory_space<vmem>>, %arg4: memref<1x128xf32, #tpu.memory_space<vmem>>) attributes {dimension_semantics = [#tpu.dimension_semantics<arbitrary>], iteration_bounds = array<i64: 1>, scalar_prefetch = 0 : i64, scratch_operands = 0 : i64, tpu.core_type = #tpu.core_type<tc>, window_params = [{pipeline_mode = #tpu.pipeline_mode<synchronous>, transform_indices = @transform_0, window_bounds = array<i64: 80, 128>}, {pipeline_mode = #tpu.pipeline_mode<synchronous>, transform_indices = @transform_1, window_bounds = array<i64: 1, 80>}, {pipeline_mode = #tpu.pipeline_mode<synchronous>, transform_indices = @transform_2, window_bounds = array<i64: 1, 2>}, {pipeline_mode = #tpu.pipeline_mode<synchronous>, transform_indices = @transform_3, window_bounds = array<i64: 1, 128>}]} {
    %c0 = arith.constant 0 : index
    %c0_0 = arith.constant 0 : index
    %0 = vector.load %arg2[%c0, %c0_0] : memref<1x80xbf16, #tpu.memory_space<vmem>>, vector<1x80xbf16>
    %c0_1 = arith.constant 0 : index
    %c0_2 = arith.constant 0 : index
    %1 = vector.load %arg1[%c0_1, %c0_2] : memref<80x128xbf16, #tpu.memory_space<vmem>>, vector<80x128xbf16>
    %cst = arith.constant dense<0.000000e+00> : vector<1x128xf32>
    %2 = tpu.matmul %0, %1, %cst {dimension_numbers = #tpu.dot_dimension_numbers<[1], [0], [0], [1], [0, 0, 1, 1], [], []>} : vector<1x80xbf16>, vector<80x128xbf16>, vector<1x128xf32> -> vector<1x128xf32>
    %c0_3 = arith.constant 0 : index
    %c0_4 = arith.constant 0 : index
    %3 = vector.load %arg3[%c0_3, %c0_4] : memref<1x2xf32, #tpu.memory_space<vmem>>, vector<1x1xf32>
    %4 = vector.broadcast %3 : vector<1x1xf32> to vector<1x128xf32>
    %5 = arith.mulf %2, %4 : vector<1x128xf32>
    %c0_5 = arith.constant 0 : index
    %c1 = arith.constant 1 : index
    %6 = vector.load %arg3[%c0_5, %c1] : memref<1x2xf32, #tpu.memory_space<vmem>>, vector<1x1xf32>
    %7 = vector.broadcast %6 : vector<1x1xf32> to vector<1x128xf32>
    %8 = arith.addf %5, %7 : vector<1x128xf32>
    %cst_6 = arith.constant 0.000000e+00 : f32
    %9 = vector.broadcast %cst_6 : f32 to vector<1x128xf32>
    %10 = arith.maximumf %8, %9 : vector<1x128xf32>
    %c0_7 = arith.constant 0 : index
    %c0_8 = arith.constant 0 : index
    %11 = vector.load %arg4[%c0_7, %c0_8] : memref<1x128xf32, #tpu.memory_space<vmem>>, vector<1x128xf32>
    tpu.vector_store %arg4[%c0_7, %c0_8], %10 {strides = array<i32>} : memref<1x128xf32, #tpu.memory_space<vmem>>, vector<1x128xf32>,
    return
  }
  func.func @transform_0(%arg0: i32) -> (i32, i32) {
    %c0_i32 = arith.constant 0 : i32
    %c0_i32_0 = arith.constant 0 : i32
    %c0_i32_1 = arith.constant 0 : i32
    return %c0_i32, %c0_i32_0 : i32, i32
  }
  func.func @transform_1(%arg0: i32) -> (i32, i32) {
    %c0_i32 = arith.constant 0 : i32
    %c0_i32_0 = arith.constant 0 : i32
    %c0_i32_1 = arith.constant 0 : i32
    return %c0_i32, %c0_i32_0 : i32, i32
  }
  func.func @transform_2(%arg0: i32) -> (i32, i32) {
    %c0_i32 = arith.constant 0 : i32
    %c0_i32_0 = arith.constant 0 : i32
    %c0_i32_1 = arith.constant 0 : i32
    return %c0_i32, %c0_i32_0 : i32, i32
  }
  func.func @transform_3(%arg0: i32) -> (i32, i32) {
    %c0_i32 = arith.constant 0 : i32
    %c0_i32_0 = arith.constant 0 : i32
    %c0_i32_1 = arith.constant 0 : i32
    return %c0_i32, %c0_i32_0 : i32, i32
  }
}

module attributes {stable_mosaic.version = 11 : i64} {
  func.func @_matmul_bn_act_kernel(%arg0: i32, %arg1: memref<80x128xbf16, #tpu.memory_space<vmem>>, %arg2: memref<64x80xbf16, #tpu.memory_space<vmem>>, %arg3: memref<64x2xf32, #tpu.memory_space<vmem>>, %arg4: memref<64x128xbf16, #tpu.memory_space<vmem>>) attributes {dimension_semantics = [#tpu.dimension_semantics<arbitrary>], iteration_bounds = array<i64: 1>, scalar_prefetch = 0 : i64, scratch_operands = 0 : i64, tpu.core_type = #tpu.core_type<tc>, window_params = [{pipeline_mode = #tpu.pipeline_mode<synchronous>, transform_indices = @transform_0, window_bounds = array<i64: 80, 128>}, {pipeline_mode = #tpu.pipeline_mode<synchronous>, transform_indices = @transform_1, window_bounds = array<i64: 64, 80>}, {pipeline_mode = #tpu.pipeline_mode<synchronous>, transform_indices = @transform_2, window_bounds = array<i64: 64, 2>}, {pipeline_mode = #tpu.pipeline_mode<synchronous>, transform_indices = @transform_3, window_bounds = array<i64: 64, 128>}]} {
    %c0 = arith.constant 0 : index
    %c0_0 = arith.constant 0 : index
    %0 = vector.load %arg2[%c0, %c0_0] : memref<64x80xbf16, #tpu.memory_space<vmem>>, vector<64x80xbf16>
    %c0_1 = arith.constant 0 : index
    %c0_2 = arith.constant 0 : index
    %1 = vector.load %arg1[%c0_1, %c0_2] : memref<80x128xbf16, #tpu.memory_space<vmem>>, vector<80x128xbf16>
    %cst = arith.constant dense<0.000000e+00> : vector<64x128xf32>
    %2 = tpu.matmul %0, %1, %cst {dimension_numbers = #tpu.dot_dimension_numbers<[1], [0], [0], [1], [0, 0, 1, 1], [], []>} : vector<64x80xbf16>, vector<80x128xbf16>, vector<64x128xf32> -> vector<64x128xf32>
    %cst_3 = arith.constant 0.000000e+00 : f32
    %3 = vector.broadcast %cst_3 : f32 to vector<16x1xf32>
    %cst_4 = arith.constant 0.000000e+00 : f32
    %4 = vector.broadcast %cst_4 : f32 to vector<16x1xf32>
    %5 = vector.extract_strided_slice %2 {offsets = [0, 0], sizes = [16, 128], strides = [1, 1]} : vector<64x128xf32> to vector<16x128xf32>
    %cst_5 = arith.constant dense<0.000000e+00> : vector<16xf32>
    %6 = vector.multi_reduction <add>, %5, %cst_5 [1] : vector<16x128xf32> to vector<16xf32>
    %7 = vector.shape_cast %6 : vector<16xf32> to vector<16x1xf32>
    %8 = arith.addf %3, %7 : vector<16x1xf32>
    %9 = arith.mulf %5, %5 : vector<16x128xf32>
    %cst_6 = arith.constant dense<0.000000e+00> : vector<16xf32>
    %10 = vector.multi_reduction <add>, %9, %cst_6 [1] : vector<16x128xf32> to vector<16xf32>
    %11 = vector.shape_cast %10 : vector<16xf32> to vector<16x1xf32>
    %12 = arith.addf %4, %11 : vector<16x1xf32>
    %13 = vector.extract_strided_slice %2 {offsets = [16, 0], sizes = [16, 128], strides = [1, 1]} : vector<64x128xf32> to vector<16x128xf32>
    %cst_7 = arith.constant dense<0.000000e+00> : vector<16xf32>
    %14 = vector.multi_reduction <add>, %13, %cst_7 [1] : vector<16x128xf32> to vector<16xf32>
    %15 = vector.shape_cast %14 : vector<16xf32> to vector<16x1xf32>
    %16 = arith.addf %8, %15 : vector<16x1xf32>
    %17 = arith.mulf %13, %13 : vector<16x128xf32>
    %cst_8 = arith.constant dense<0.000000e+00> : vector<16xf32>
    %18 = vector.multi_reduction <add>, %17, %cst_8 [1] : vector<16x128xf32> to vector<16xf32>
    %19 = vector.shape_cast %18 : vector<16xf32> to vector<16x1xf32>
    %20 = arith.addf %12, %19 : vector<16x1xf32>
    %21 = vector.extract_strided_slice %2 {offsets = [32, 0], sizes = [16, 128], strides = [1, 1]} : vector<64x128xf32> to vector<16x128xf32>
    %cst_9 = arith.constant dense<0.000000e+00> : vector<16xf32>
    %22 = vector.multi_reduction <add>, %21, %cst_9 [1] : vector<16x128xf32> to vector<16xf32>
    %23 = vector.shape_cast %22 : vector<16xf32> to vector<16x1xf32>
    %24 = arith.addf %16, %23 : vector<16x1xf32>
    %25 = arith.mulf %21, %21 : vector<16x128xf32>
    %cst_10 = arith.constant dense<0.000000e+00> : vector<16xf32>
    %26 = vector.multi_reduction <add>, %25, %cst_10 [1] : vector<16x128xf32> to vector<16xf32>
    %27 = vector.shape_cast %26 : vector<16xf32> to vector<16x1xf32>
    %28 = arith.addf %20, %27 : vector<16x1xf32>
    %29 = vector.extract_strided_slice %2 {offsets = [48, 0], sizes = [16, 128], strides = [1, 1]} : vector<64x128xf32> to vector<16x128xf32>
    %cst_11 = arith.constant dense<0.000000e+00> : vector<16xf32>
    %30 = vector.multi_reduction <add>, %29, %cst_11 [1] : vector<16x128xf32> to vector<16xf32>
    %31 = vector.shape_cast %30 : vector<16xf32> to vector<16x1xf32>
    %32 = arith.addf %24, %31 : vector<16x1xf32>
    %33 = arith.mulf %29, %29 : vector<16x128xf32>
    %cst_12 = arith.constant dense<0.000000e+00> : vector<16xf32>
    %34 = vector.multi_reduction <add>, %33, %cst_12 [1] : vector<16x128xf32> to vector<16xf32>
    %35 = vector.shape_cast %34 : vector<16xf32> to vector<16x1xf32>
    %36 = arith.addf %28, %35 : vector<16x1xf32>
    %cst_13 = arith.constant 0.00255102036 : f32
    %37 = vector.broadcast %cst_13 : f32 to vector<16x1xf32>
    %38 = arith.mulf %32, %37 : vector<16x1xf32>
    %cst_14 = arith.constant 0.00255102036 : f32
    %39 = vector.broadcast %cst_14 : f32 to vector<16x1xf32>
    %40 = arith.mulf %36, %39 : vector<16x1xf32>
    %41 = arith.mulf %38, %38 : vector<16x1xf32>
    %42 = arith.subf %40, %41 : vector<16x1xf32>
    %cst_15 = arith.constant 0.000000e+00 : f32
    %43 = vector.broadcast %cst_15 : f32 to vector<16x1xf32>
    %44 = arith.maximumf %42, %43 : vector<16x1xf32>
    %cst_16 = arith.constant 9.99999974E-6 : f32
    %45 = vector.broadcast %cst_16 : f32 to vector<16x1xf32>
    %46 = arith.addf %44, %45 : vector<16x1xf32>
    %47 = math.rsqrt %46 : vector<16x1xf32>
    %48 = vector.extract_strided_slice %2 {offsets = [0, 0], sizes = [16, 128], strides = [1, 1]} : vector<64x128xf32> to vector<16x128xf32>
    %49 = vector.broadcast %38 : vector<16x1xf32> to vector<16x128xf32>
    %50 = arith.subf %48, %49 : vector<16x128xf32>
    %51 = vector.broadcast %47 : vector<16x1xf32> to vector<16x128xf32>
    %52 = arith.mulf %50, %51 : vector<16x128xf32>
    %c0_17 = arith.constant 0 : index
    %c0_18 = arith.constant 0 : index
    %53 = vector.load %arg3[%c0_17, %c0_18] : memref<64x2xf32, #tpu.memory_space<vmem>>, vector<16x1xf32>
    %54 = vector.broadcast %53 : vector<16x1xf32> to vector<16x128xf32>
    %55 = arith.mulf %52, %54 : vector<16x128xf32>
    %c0_19 = arith.constant 0 : index
    %c1 = arith.constant 1 : index
    %56 = vector.load %arg3[%c0_19, %c1] : memref<64x2xf32, #tpu.memory_space<vmem>>, vector<16x1xf32>
    %57 = vector.broadcast %56 : vector<16x1xf32> to vector<16x128xf32>
    %58 = arith.addf %55, %57 : vector<16x128xf32>
    %cst_20 = arith.constant 0.000000e+00 : f32
    %59 = vector.broadcast %cst_20 : f32 to vector<16x128xf32>
    %60 = arith.maximumf %58, %59 : vector<16x128xf32>
    %61 = arith.truncf %60 : vector<16x128xf32> to vector<16x128xbf16>
    %c0_21 = arith.constant 0 : index
    %c0_22 = arith.constant 0 : index
    %62 = vector.load %arg4[%c0_21, %c0_22] : memref<64x128xbf16, #tpu.memory_space<vmem>>, vector<16x128xbf16>
    tpu.vector_store %arg4[%c0_21, %c0_22], %61 {strides = array<i32>} : memref<64x128xbf16, #tpu.memory_space<vmem>>, vector<16x128xbf16>,
    %63 = vector.extract_strided_slice %2 {offsets = [16, 0], sizes = [16, 128], strides = [1, 1]} : vector<64x128xf32> to vector<16x128xf32>
    %64 = vector.broadcast %38 : vector<16x1xf32> to vector<16x128xf32>
    %65 = arith.subf %63, %64 : vector<16x128xf32>
    %66 = vector.broadcast %47 : vector<16x1xf32> to vector<16x128xf32>
    %67 = arith.mulf %65, %66 : vector<16x128xf32>
    %c16 = arith.constant 16 : index
    %c0_23 = arith.constant 0 : index
    %68 = vector.load %arg3[%c16, %c0_23] : memref<64x2xf32, #tpu.memory_space<vmem>>, vector<16x1xf32>
    %69 = vector.broadcast %68 : vector<16x1xf32> to vector<16x128xf32>
    %70 = arith.mulf %67, %69 : vector<16x128xf32>
    %c16_24 = arith.constant 16 : index
    %c1_25 = arith.constant 1 : index
    %71 = vector.load %arg3[%c16_24, %c1_25] : memref<64x2xf32, #tpu.memory_space<vmem>>, vector<16x1xf32>
    %72 = vector.broadcast %71 : vector<16x1xf32> to vector<16x128xf32>
    %73 = arith.addf %70, %72 : vector<16x128xf32>
    %cst_26 = arith.constant 0.000000e+00 : f32
    %74 = vector.broadcast %cst_26 : f32 to vector<16x128xf32>
    %75 = arith.maximumf %73, %74 : vector<16x128xf32>
    %76 = arith.truncf %75 : vector<16x128xf32> to vector<16x128xbf16>
    %c16_27 = arith.constant 16 : index
    %c0_28 = arith.constant 0 : index
    %77 = vector.load %arg4[%c16_27, %c0_28] : memref<64x128xbf16, #tpu.memory_space<vmem>>, vector<16x128xbf16>
    tpu.vector_store %arg4[%c16_27, %c0_28], %76 {strides = array<i32>} : memref<64x128xbf16, #tpu.memory_space<vmem>>, vector<16x128xbf16>,
    %78 = vector.extract_strided_slice %2 {offsets = [32, 0], sizes = [16, 128], strides = [1, 1]} : vector<64x128xf32> to vector<16x128xf32>
    %79 = vector.broadcast %38 : vector<16x1xf32> to vector<16x128xf32>
    %80 = arith.subf %78, %79 : vector<16x128xf32>
    %81 = vector.broadcast %47 : vector<16x1xf32> to vector<16x128xf32>
    %82 = arith.mulf %80, %81 : vector<16x128xf32>
    %c32 = arith.constant 32 : index
    %c0_29 = arith.constant 0 : index
    %83 = vector.load %arg3[%c32, %c0_29] : memref<64x2xf32, #tpu.memory_space<vmem>>, vector<16x1xf32>
    %84 = vector.broadcast %83 : vector<16x1xf32> to vector<16x128xf32>
    %85 = arith.mulf %82, %84 : vector<16x128xf32>
    %c32_30 = arith.constant 32 : index
    %c1_31 = arith.constant 1 : index
    %86 = vector.load %arg3[%c32_30, %c1_31] : memref<64x2xf32, #tpu.memory_space<vmem>>, vector<16x1xf32>
    %87 = vector.broadcast %86 : vector<16x1xf32> to vector<16x128xf32>
    %88 = arith.addf %85, %87 : vector<16x128xf32>
    %cst_32 = arith.constant 0.000000e+00 : f32
    %89 = vector.broadcast %cst_32 : f32 to vector<16x128xf32>
    %90 = arith.maximumf %88, %89 : vector<16x128xf32>
    %91 = arith.truncf %90 : vector<16x128xf32> to vector<16x128xbf16>
    %c32_33 = arith.constant 32 : index
    %c0_34 = arith.constant 0 : index
    %92 = vector.load %arg4[%c32_33, %c0_34] : memref<64x128xbf16, #tpu.memory_space<vmem>>, vector<16x128xbf16>
    tpu.vector_store %arg4[%c32_33, %c0_34], %91 {strides = array<i32>} : memref<64x128xbf16, #tpu.memory_space<vmem>>, vector<16x128xbf16>,
    %93 = vector.extract_strided_slice %2 {offsets = [48, 0], sizes = [16, 128], strides = [1, 1]} : vector<64x128xf32> to vector<16x128xf32>
    %94 = vector.broadcast %38 : vector<16x1xf32> to vector<16x128xf32>
    %95 = arith.subf %93, %94 : vector<16x128xf32>
    %96 = vector.broadcast %47 : vector<16x1xf32> to vector<16x128xf32>
    %97 = arith.mulf %95, %96 : vector<16x128xf32>
    %c48 = arith.constant 48 : index
    %c0_35 = arith.constant 0 : index
    %98 = vector.load %arg3[%c48, %c0_35] : memref<64x2xf32, #tpu.memory_space<vmem>>, vector<16x1xf32>
    %99 = vector.broadcast %98 : vector<16x1xf32> to vector<16x128xf32>
    %100 = arith.mulf %97, %99 : vector<16x128xf32>
    %c48_36 = arith.constant 48 : index
    %c1_37 = arith.constant 1 : index
    %101 = vector.load %arg3[%c48_36, %c1_37] : memref<64x2xf32, #tpu.memory_space<vmem>>, vector<16x1xf32>
    %102 = vector.broadcast %101 : vector<16x1xf32> to vector<16x128xf32>
    %103 = arith.addf %100, %102 : vector<16x128xf32>
    %cst_38 = arith.constant 0.000000e+00 : f32
    %104 = vector.broadcast %cst_38 : f32 to vector<16x128xf32>
    %105 = arith.maximumf %103, %104 : vector<16x128xf32>
    %106 = arith.truncf %105 : vector<16x128xf32> to vector<16x128xbf16>
    %c48_39 = arith.constant 48 : index
    %c0_40 = arith.constant 0 : index
    %107 = vector.load %arg4[%c48_39, %c0_40] : memref<64x128xbf16, #tpu.memory_space<vmem>>, vector<16x128xbf16>
    tpu.vector_store %arg4[%c48_39, %c0_40], %106 {strides = array<i32>} : memref<64x128xbf16, #tpu.memory_space<vmem>>, vector<16x128xbf16>,
    return
  }
  func.func @transform_0(%arg0: i32) -> (i32, i32) {
    %c0_i32 = arith.constant 0 : i32
    %c0_i32_0 = arith.constant 0 : i32
    %c0_i32_1 = arith.constant 0 : i32
    return %c0_i32, %c0_i32_0 : i32, i32
  }
  func.func @transform_1(%arg0: i32) -> (i32, i32) {
    %c0_i32 = arith.constant 0 : i32
    %c0_i32_0 = arith.constant 0 : i32
    %c0_i32_1 = arith.constant 0 : i32
    return %c0_i32, %c0_i32_0 : i32, i32
  }
  func.func @transform_2(%arg0: i32) -> (i32, i32) {
    %c0_i32 = arith.constant 0 : i32
    %c0_i32_0 = arith.constant 0 : i32
    %c0_i32_1 = arith.constant 0 : i32
    return %c0_i32, %c0_i32_0 : i32, i32
  }
  func.func @transform_3(%arg0: i32) -> (i32, i32) {
    %c0_i32 = arith.constant 0 : i32
    %c0_i32_0 = arith.constant 0 : i32
    %c0_i32_1 = arith.constant 0 : i32
    return %c0_i32, %c0_i32_0 : i32, i32
  }
}

module attributes {stable_mosaic.version = 11 : i64} {
  func.func @_matmul_bn_act_kernel(%arg0: i32, %arg1: memref<16x128xbf16, #tpu.memory_space<vmem>>, %arg2: memref<8x16xbf16, #tpu.memory_space<vmem>>, %arg3: memref<8x2xf32, #tpu.memory_space<vmem>>, %arg4: memref<8x128xbf16, #tpu.memory_space<vmem>>) attributes {dimension_semantics = [#tpu.dimension_semantics<arbitrary>], iteration_bounds = array<i64: 1>, scalar_prefetch = 0 : i64, scratch_operands = 0 : i64, tpu.core_type = #tpu.core_type<tc>, window_params = [{pipeline_mode = #tpu.pipeline_mode<synchronous>, transform_indices = @transform_0, window_bounds = array<i64: 16, 128>}, {pipeline_mode = #tpu.pipeline_mode<synchronous>, transform_indices = @transform_1, window_bounds = array<i64: 8, 16>}, {pipeline_mode = #tpu.pipeline_mode<synchronous>, transform_indices = @transform_2, window_bounds = array<i64: 8, 2>}, {pipeline_mode = #tpu.pipeline_mode<synchronous>, transform_indices = @transform_3, window_bounds = array<i64: 8, 128>}]} {
    %c0 = arith.constant 0 : index
    %c0_0 = arith.constant 0 : index
    %0 = vector.load %arg2[%c0, %c0_0] : memref<8x16xbf16, #tpu.memory_space<vmem>>, vector<8x16xbf16>
    %c0_1 = arith.constant 0 : index
    %c0_2 = arith.constant 0 : index
    %1 = vector.load %arg1[%c0_1, %c0_2] : memref<16x128xbf16, #tpu.memory_space<vmem>>, vector<16x128xbf16>
    %cst = arith.constant dense<0.000000e+00> : vector<8x128xf32>
    %2 = tpu.matmul %0, %1, %cst {dimension_numbers = #tpu.dot_dimension_numbers<[1], [0], [0], [1], [0, 0, 1, 1], [], []>} : vector<8x16xbf16>, vector<16x128xbf16>, vector<8x128xf32> -> vector<8x128xf32>
    %cst_3 = arith.constant dense<0.000000e+00> : vector<8xf32>
    %3 = vector.multi_reduction <add>, %2, %cst_3 [1] : vector<8x128xf32> to vector<8xf32>
    %4 = vector.shape_cast %3 : vector<8xf32> to vector<8x1xf32>
    %cst_4 = arith.constant 0.0102040814 : f32
    %5 = vector.broadcast %cst_4 : f32 to vector<8x1xf32>
    %6 = arith.mulf %4, %5 : vector<8x1xf32>
    %7 = arith.mulf %2, %2 : vector<8x128xf32>
    %cst_5 = arith.constant dense<0.000000e+00> : vector<8xf32>
    %8 = vector.multi_reduction <add>, %7, %cst_5 [1] : vector<8x128xf32> to vector<8xf32>
    %9 = vector.shape_cast %8 : vector<8xf32> to vector<8x1xf32>
    %cst_6 = arith.constant 0.0102040814 : f32
    %10 = vector.broadcast %cst_6 : f32 to vector<8x1xf32>
    %11 = arith.mulf %9, %10 : vector<8x1xf32>
    %12 = arith.mulf %6, %6 : vector<8x1xf32>
    %13 = arith.subf %11, %12 : vector<8x1xf32>
    %cst_7 = arith.constant 0.000000e+00 : f32
    %14 = vector.broadcast %cst_7 : f32 to vector<8x1xf32>
    %15 = arith.maximumf %13, %14 : vector<8x1xf32>
    %16 = vector.broadcast %6 : vector<8x1xf32> to vector<8x128xf32>
    %17 = arith.subf %2, %16 : vector<8x128xf32>
    %cst_8 = arith.constant 9.99999974E-6 : f32
    %18 = vector.broadcast %cst_8 : f32 to vector<8x1xf32>
    %19 = arith.addf %15, %18 : vector<8x1xf32>
    %20 = math.rsqrt %19 : vector<8x1xf32>
    %21 = vector.broadcast %20 : vector<8x1xf32> to vector<8x128xf32>
    %22 = arith.mulf %17, %21 : vector<8x128xf32>
    %c0_9 = arith.constant 0 : index
    %c0_10 = arith.constant 0 : index
    %23 = vector.load %arg3[%c0_9, %c0_10] : memref<8x2xf32, #tpu.memory_space<vmem>>, vector<8x1xf32>
    %24 = vector.broadcast %23 : vector<8x1xf32> to vector<8x128xf32>
    %25 = arith.mulf %22, %24 : vector<8x128xf32>
    %c0_11 = arith.constant 0 : index
    %c1 = arith.constant 1 : index
    %26 = vector.load %arg3[%c0_11, %c1] : memref<8x2xf32, #tpu.memory_space<vmem>>, vector<8x1xf32>
    %27 = vector.broadcast %26 : vector<8x1xf32> to vector<8x128xf32>
    %28 = arith.addf %25, %27 : vector<8x128xf32>
    %cst_12 = arith.constant 0.000000e+00 : f32
    %29 = vector.broadcast %cst_12 : f32 to vector<8x128xf32>
    %30 = arith.maximumf %28, %29 : vector<8x128xf32>
    %31 = arith.truncf %30 : vector<8x128xf32> to vector<8x128xbf16>
    %c0_13 = arith.constant 0 : index
    %c0_14 = arith.constant 0 : index
    %32 = vector.load %arg4[%c0_13, %c0_14] : memref<8x128xbf16, #tpu.memory_space<vmem>>, vector<8x128xbf16>
    tpu.vector_store %arg4[%c0_13, %c0_14], %31 {strides = array<i32>} : memref<8x128xbf16, #tpu.memory_space<vmem>>, vector<8x128xbf16>,
    return
  }
  func.func @transform_0(%arg0: i32) -> (i32, i32) {
    %c0_i32 = arith.constant 0 : i32
    %c0_i32_0 = arith.constant 0 : i32
    %c0_i32_1 = arith.constant 0 : i32
    return %c0_i32, %c0_i32_0 : i32, i32
  }
  func.func @transform_1(%arg0: i32) -> (i32, i32) {
    %c0_i32 = arith.constant 0 : i32
    %c0_i32_0 = arith.constant 0 : i32
    %c0_i32_1 = arith.constant 0 : i32
    return %c0_i32, %c0_i32_0 : i32, i32
  }
  func.func @transform_2(%arg0: i32) -> (i32, i32) {
    %c0_i32 = arith.constant 0 : i32
    %c0_i32_0 = arith.constant 0 : i32
    %c0_i32_1 = arith.constant 0 : i32
    return %c0_i32, %c0_i32_0 : i32, i32
  }
  func.func @transform_3(%arg0: i32) -> (i32, i32) {
    %c0_i32 = arith.constant 0 : i32
    %c0_i32_0 = arith.constant 0 : i32
    %c0_i32_1 = arith.constant 0 : i32
    return %c0_i32, %c0_i32_0 : i32, i32
  }
}

module attributes {stable_mosaic.version = 11 : i64} {
  func.func @_matmul_bn_act_kernel(%arg0: i32, %arg1: memref<144x512xbf16, #tpu.memory_space<vmem>>, %arg2: memref<4x144xbf16, #tpu.memory_space<vmem>>, %arg3: memref<4x2xf32, #tpu.memory_space<vmem>>, %arg4: memref<4x512xf32, #tpu.memory_space<vmem>>) attributes {dimension_semantics = [#tpu.dimension_semantics<arbitrary>], iteration_bounds = array<i64: 1>, scalar_prefetch = 0 : i64, scratch_operands = 0 : i64, tpu.core_type = #tpu.core_type<tc>, window_params = [{pipeline_mode = #tpu.pipeline_mode<synchronous>, transform_indices = @transform_0, window_bounds = array<i64: 144, 512>}, {pipeline_mode = #tpu.pipeline_mode<synchronous>, transform_indices = @transform_1, window_bounds = array<i64: 4, 144>}, {pipeline_mode = #tpu.pipeline_mode<synchronous>, transform_indices = @transform_2, window_bounds = array<i64: 4, 2>}, {pipeline_mode = #tpu.pipeline_mode<synchronous>, transform_indices = @transform_3, window_bounds = array<i64: 4, 512>}]} {
    %c0 = arith.constant 0 : index
    %c0_0 = arith.constant 0 : index
    %0 = vector.load %arg2[%c0, %c0_0] : memref<4x144xbf16, #tpu.memory_space<vmem>>, vector<4x144xbf16>
    %c0_1 = arith.constant 0 : index
    %c0_2 = arith.constant 0 : index
    %1 = vector.load %arg1[%c0_1, %c0_2] : memref<144x512xbf16, #tpu.memory_space<vmem>>, vector<144x512xbf16>
    %cst = arith.constant dense<0.000000e+00> : vector<4x512xf32>
    %2 = tpu.matmul %0, %1, %cst {dimension_numbers = #tpu.dot_dimension_numbers<[1], [0], [0], [1], [0, 0, 1, 1], [], []>} : vector<4x144xbf16>, vector<144x512xbf16>, vector<4x512xf32> -> vector<4x512xf32>
    %c0_3 = arith.constant 0 : index
    %c0_4 = arith.constant 0 : index
    %3 = vector.load %arg3[%c0_3, %c0_4] : memref<4x2xf32, #tpu.memory_space<vmem>>, vector<4x1xf32>
    %4 = vector.broadcast %3 : vector<4x1xf32> to vector<4x512xf32>
    %5 = arith.mulf %2, %4 : vector<4x512xf32>
    %c0_5 = arith.constant 0 : index
    %c1 = arith.constant 1 : index
    %6 = vector.load %arg3[%c0_5, %c1] : memref<4x2xf32, #tpu.memory_space<vmem>>, vector<4x1xf32>
    %7 = vector.broadcast %6 : vector<4x1xf32> to vector<4x512xf32>
    %8 = arith.addf %5, %7 : vector<4x512xf32>
    %9 = arith.negf %8 : vector<4x512xf32>
    %10 = math.exp %9 : vector<4x512xf32>
    %cst_6 = arith.constant 1.000000e+00 : f32
    %11 = vector.broadcast %cst_6 : f32 to vector<4x512xf32>
    %12 = arith.addf %11, %10 : vector<4x512xf32>
    %13 = arith.divf %11, %12 : vector<4x512xf32>
    %c0_7 = arith.constant 0 : index
    %c0_8 = arith.constant 0 : index
    %14 = vector.load %arg4[%c0_7, %c0_8] : memref<4x512xf32, #tpu.memory_space<vmem>>, vector<4x512xf32>
    tpu.vector_store %arg4[%c0_7, %c0_8], %13 {strides = array<i32>} : memref<4x512xf32, #tpu.memory_space<vmem>>, vector<4x512xf32>,
    return
  }
  func.func @transform_0(%arg0: i32) -> (i32, i32) {
    %c0_i32 = arith.constant 0 : i32
    %c0_i32_0 = arith.constant 0 : i32
    %c0_i32_1 = arith.constant 0 : i32
    return %c0_i32, %c0_i32_0 : i32, i32
  }
  func.func @transform_1(%arg0: i32) -> (i32, i32) {
    %c0_i32 = arith.constant 0 : i32
    %c0_i32_0 = arith.constant 0 : i32
    %c0_i32_1 = arith.constant 0 : i32
    return %c0_i32, %c0_i32_0 : i32, i32
  }
  func.func @transform_2(%arg0: i32) -> (i32, i32) {
    %c0_i32 = arith.constant 0 : i32
    %c0_i32_0 = arith.constant 0 : i32
    %c0_i32_1 = arith.constant 0 : i32
    return %c0_i32, %c0_i32_0 : i32, i32
  }
  func.func @transform_3(%arg0: i32) -> (i32, i32) {
    %c0_i32 = arith.constant 0 : i32
    %c0_i32_0 = arith.constant 0 : i32
    %c0_i32_1 = arith.constant 0 : i32
    return %c0_i32, %c0_i32_0 : i32, i32
  }
}

</mosaic_0001>

<bundles_post_ra>
// kernel: autoencoder_forward.6
= control target key start
LH: loop header
LB: loop body
LE: loop exit
PB: predicated region body
PF: predicated region fallthrough
CT: control target
= control target key end

     0   :  { %v302_v1 = vmov 0   ;;  %vm46_vm0 = vcmask 130048   ;;  %v303_v8 = vmov 1   ;;  %s387_s0 = inlined_call_operand.vmem [shape: bf16[16,512], index: 0, kind: input, shape index: {}]   ;;  %s388_s1 = inlined_call_operand.vmem [shape: bf16[16,16], index: 1, kind: input, shape index: {}]   ;;  %s389_s2 = inlined_call_operand.vmem [shape: f32[16,2], index: 2, kind: input, shape index: {}]   ;;  %s390_s3 = inlined_call_operand.vmem [shape: bf16[16,512], index: 3, kind: output, shape index: {}]  }
   0x1   :  { %v291_v0 = vld [vmem:[%s387_s0 + $0x4] ss:$16 sps:$4 sm:$0xff]   ;;  %82 = vmatprep.mubr.bf16.mxu0 %v302_v1  ;;  %125 = vmatprep.mubr.bf16.mxu1 %v302_v1  ;;  %v293_v2 = vld [vmem:[%s387_s0 + $0xc] ss:$16 sps:$4 sm:$0xff]   ;;  %v295_v3 = vld [vmem:[%s387_s0] ss:$16 sps:$4 sm:$0xff]  }
   0x2   :  { %288 = vset.pattern.permute.xlu1 %v302_v1  ;;  %287 = vset.pattern.permute.xlu0 %v302_v1  ;;  %v296_v4 = vld [vmem:[%s387_s0 + $0x8] ss:$16 sps:$4 sm:$0xff]   ;;  %v297_v5 = vld [vmem:[%s388_s1] sm:$0xff]  }
   0x3   :  { %50 = vmatprep.subr.bf16.mxu0 %v291_v0  ;;  %93 = vmatprep.subr.bf16.mxu1 %v293_v2  ;;  %v195_v6 = vld [vmem:[%s389_s2 + $0x8] sm:$0xff]  ;;  %v194_v7 = vld [vmem:[%s389_s2] sm:$0xff] }
   0x4   :  { %51 = vmatpush1.bf16.msra.mxu0 %v295_v3  ;;  %94 = vmatpush1.bf16.msra.mxu1 %v296_v4 }
   0x5   :  { %203 = vperm.xlu1 %288, %v195_v6  }
   0x7   :  { %275 = vmatmul.mubr.msk.bf16.vlgmr.msra.gmra.mrb[0].mxu0 %vm46_vm0, %v297_v5  ;;  %276 = vmatmul.mubr.msk.bf16.vlgmr.msra.gmra.mrb[0].mxu1 %vm46_vm0, %v297_v5 }
   0x9   :  { %289 = vset.pattern.permute.xlu1 %v303_v8 }
   0xa   :  { %215 = vperm.xlu1 %289, %v194_v7  }
  0x84   :  { %v204_v37 = vpop.permute.xlu1 %203 }
  0x89   :  { %v216_v38 = vpop.permute.xlu1 %215 }
  0xda   :  { %v84_v9 = vpop.f32.mrb[0].mxu0  ;;  %v345_v10 = vpop.f32.mrb[0].mxu1 }
  0xdb   :  { %v148_v11 = vmul.f32 %v84_v9, %v84_v9  ;;  %v86_v12 = vpop.f32.mrb[1].mxu0  ;;  %v129_v13 = vpop.f32.mrb[1].mxu1  ;;  %v150_v18 = vmul.f32 %v345_v10, %v345_v10 }
  0xdc   :  { %v136_v14 = vadd.f32 %v86_v12, %v84_v9  ;;  %v149_v15 = vmul.f32 %v86_v12, %v86_v12  ;;  %v347_v16 = vpop.f32.mrb[2].mxu0  ;;  %v349_v17 = vpop.f32.mrb[2].mxu1  ;;  %v151_v30 = vmul.f32 %v129_v13, %v129_v13 }
  0xdd   :  { %v152_v19 = vmul.f32 %v347_v16, %v347_v16  ;;  %v355_v20 = vpop.f32.mrb[3].mxu0  ;;  %v357_v21 = vpop.f32.mrb[3].mxu1  ;;  %v154_v26 = vmul.f32 %v349_v17, %v349_v17 }
  0xde   :  { %v141_v22 = vadd.f32 %v355_v20, %v347_v16  ;;  %v153_v23 = vmul.f32 %v355_v20, %v355_v20  ;;  %v137_v24 = vadd.f32 %v136_v14, %v345_v10  ;;  %v156_v25 = vadd.f32 %v149_v15, %v148_v11 }
  0xdf   :  { %v155_v32 = vmul.f32 %v357_v21, %v357_v21 }
  0xe0   :  { %v161_v27 = vadd.f32 %v153_v23, %v152_v19  ;;  %v138_v28 = vadd.f32 %v137_v24, %v129_v13  ;;  %v142_v29 = vadd.f32 %v141_v22, %v349_v17  ;;  %v157_v31 = vadd.f32 %v156_v25, %v150_v18 }
  0xe2   :  { %139 = vadd.xlane.f32.xlu0 %v138_v28  ;;  %v143_v33 = vadd.f32 %v142_v29, %v357_v21  ;;  %v162_v34 = vadd.f32 %v161_v27, %v154_v26  ;;  %v158_v35 = vadd.f32 %v157_v31, %v151_v30 }
  0xe4   :  { %v163_v36 = vadd.f32 %v162_v34, %v155_v32  ;;  %159 = vadd.xlane.f32.xlu1 %v158_v35 }
  0xe6   :  { %144 = vadd.xlane.f32.xlu0 %v143_v33 }
  0xe8   :  { %164 = vadd.xlane.f32.xlu1 %v163_v36 }
  0xf9   :  { %219 = vperm.xlu1 %289, %v195_v6  }
  0xfc   :  { %198 = vperm.xlu0 %287, %v194_v7  }
 0x100   :  { %290 = vset.pattern.permute.xlu0 %v303_v8 }
 0x16f   :  { %v140_v39 = vpop.xlane.xlu0 %139 }
 0x170   :  { %v146_v40 = vmul.f32 0.0025510204, %v140_v39 }
 0x171   :  { %v160_v41 = vpop.xlane.xlu1 %159 }
 0x172   :  { %v168_v42 = vmul.f32 %v146_v40, %v146_v40  ;;  %v166_v43 = vmul.f32 0.0025510204, %v160_v41  ;;  %v174_v55 = vsub.f32 %v84_v9, %v146_v40  ;;  %v175_v56 = vsub.f32 %v86_v12, %v146_v40 }
 0x173   :  { %v145_v44 = vpop.xlane.xlu0 %144  ;;  %v176_v57 = vsub.f32 %v345_v10, %v146_v40  ;;  %v177_v58 = vsub.f32 %v129_v13, %v146_v40 }
 0x174   :  { %v147_v45 = vmul.f32 0.0025510204, %v145_v44  ;;  %v170_v46 = vsub.f32 %v166_v43, %v168_v42 }
 0x175   :  { %v165_v47 = vpop.xlane.xlu1 %164 }
 0x176   :  { %v169_v48 = vmul.f32 %v147_v45, %v147_v45  ;;  %v172_v49 = vmax.f32 %v170_v46, 0.0  ;;  %v167_v50 = vmul.f32 0.0025510204, %v165_v47  ;;  %v178_v1 = vsub.f32 %v347_v16, %v147_v45 }
 0x177   :  { %v179_v2 = vsub.f32 %v355_v20, %v147_v45  ;;  %v180_v3 = vsub.f32 %v349_v17, %v147_v45  ;;  %v181_v4 = vsub.f32 %v357_v21, %v147_v45 }
 0x178   :  { %v182_v51 = vadd.f32 1e-05, %v172_v49  ;;  %v171_v52 = vsub.f32 %v167_v50, %v169_v48 }
 0x179   :  { %v220_v17 = vpop.permute.xlu1 %219 }
 0x17a   :  { %298 = vrsqrt.f32 %v182_v51  ;;  %v173_v53 = vmax.f32 %v171_v52, 0.0 }
 0x17b   :  { %v199_v60 = vpop.permute.xlu0 %198 }
 0x17c   :  { %v183_v54 = vadd.f32 1e-05, %v173_v53 }
 0x17e   :  { %300 = vrsqrt.f32 %v183_v54 }
 0x184   :  { %v299_v59 = vpop.eup %298 }
 0x185   :  { %v186_v61 = vmul.f32 %v299_v59, %v174_v55  ;;  %v187_v62 = vmul.f32 %v299_v59, %v175_v56  ;;  %v188_v63 = vmul.f32 %v299_v59, %v176_v57  ;;  %v189_v0 = vmul.f32 %v299_v59, %v177_v58 }
 0x187   :  { %v206_v5 = vmul.f32 %v199_v60, %v186_v61  ;;  %v207_v6 = vmul.f32 %v199_v60, %v187_v62  ;;  %v208_v7 = vmul.f32 %v199_v60, %v188_v63  ;;  %v209_v8 = vmul.f32 %v199_v60, %v189_v0 }
 0x188   :  { %v301_v9 = vpop.eup %300 }
 0x189   :  { %v190_v10 = vmul.f32 %v301_v9, %v178_v1  ;;  %v191_v11 = vmul.f32 %v301_v9, %v179_v2  ;;  %v192_v12 = vmul.f32 %v301_v9, %v180_v3  ;;  %v193_v13 = vmul.f32 %v301_v9, %v181_v4 }
 0x18a   :  { %v222_v14 = vadd.f32 %v216_v38, %v206_v5  ;;  %v223_v15 = vadd.f32 %v216_v38, %v207_v6  ;;  %v224_v18 = vadd.f32 %v216_v38, %v208_v7  ;;  %v225_v19 = vadd.f32 %v216_v38, %v209_v8 }
 0x18b   :  { %v210_v16 = vmul.f32 %v204_v37, %v190_v10  ;;  %v211_v22 = vmul.f32 %v204_v37, %v191_v11  ;;  %v212_v20 = vmul.f32 %v204_v37, %v192_v12  ;;  %v213_v23 = vmul.f32 %v204_v37, %v193_v13 }
 0x18c   :  { %v230_v24 = vmax.f32 %v222_v14, 0.0  ;;  %v231_v21 = vmax.f32 %v223_v15, 0.0  ;;  %v232_v25 = vmax.f32 %v224_v18, 0.0  ;;  %v233_v26 = vmax.f32 %v225_v19, 0.0 }
 0x18d   :  { %v226_v27 = vadd.f32 %v220_v17, %v210_v16  ;;  %v227_v28 = vadd.f32 %v220_v17, %v211_v22  ;;  %v228_v29 = vadd.f32 %v220_v17, %v212_v20  ;;  %v229_v30 = vadd.f32 %v220_v17, %v213_v23 }
 0x18e   :  { %v281_v31 = vpack.c.bf16 %v231_v21, %v230_v24  ;;  %v282_v32 = vpack.c.bf16 %v233_v26, %v232_v25 }
 0x18f   :  { %v234_v33 = vmax.f32 %v226_v27, 0.0  ;;  %v235_v34 = vmax.f32 %v227_v28, 0.0  ;;  %v236_v35 = vmax.f32 %v228_v29, 0.0  ;;  %v237_v36 = vmax.f32 %v229_v30, 0.0 }
 0x190   :  { %262 = vst [vmem:[%s390_s3] sm:$0xff] %v281_v31  ;;  %263 = vst [vmem:[%s390_s3 + $0x8] sm:$0xff] %v282_v32 }
 0x191   :  { %v283_v37 = vpack.c.bf16 %v235_v34, %v234_v33  ;;  %v284_v38 = vpack.c.bf16 %v237_v36, %v236_v35 }
 0x193   :  { %264 = vst [vmem:[%s390_s3 + $0x10] sm:$0xff] %v283_v37  ;;  %265 = vst [vmem:[%s390_s3 + $0x18] sm:$0xff] %v284_v38 }

// kernel: autoencoder_forward.7
= control target key start
LH: loop header
LB: loop body
LE: loop exit
PB: predicated region body
PF: predicated region fallthrough
CT: control target
= control target key end

     0   :  { %v289_v19 = vmov 0   ;;  %v290_v21 = vmov 1   ;;  %s368_s0 = inlined_call_operand.vmem [shape: bf16[256,128], index: 0, kind: input, shape index: {}]   ;;  %s369_s1 = inlined_call_operand.vmem [shape: bf16[8,256], index: 1, kind: input, shape index: {}]   ;;  %s370_s2 = inlined_call_operand.vmem [shape: f32[8,2], index: 2, kind: input, shape index: {}]   ;;  %s371_s3 = inlined_call_operand.vmem [shape: bf16[8,128], index: 3, kind: output, shape index: {}]  }
   0x1   :  { %v269_v0 = vld [vmem:[%s368_s0 + $0x40] sm:$0xff]   ;;  %v271_v2 = vld [vmem:[%s368_s0 + $0x48] sm:$0xff]   ;;  %v273_v4 = vld [vmem:[%s368_s0 + $0x50] sm:$0xff]   ;;  %266 = vset.pattern.permute.xlu1 %v289_v19  ;;  %268 = vset.pattern.permute.xlu0 %v290_v21 }
   0x2   :  { %v270_v1 = vld [vmem:[%s368_s0] sm:$0xff]   ;;  %242 = vmatprep.subr.bf16.mxu0 %v269_v0  ;;  %v272_v3 = vld [vmem:[%s368_s0 + $0x8] sm:$0xff]   ;;  %v274_v5 = vld [vmem:[%s368_s0 + $0x10] sm:$0xff]  }
   0x3   :  { %243 = vmatpush3.bf16.msra.mxu0 %v270_v1  ;;  %v275_v6 = vld [vmem:[%s368_s0 + $0x58] sm:$0xff]   ;;  %v277_v8 = vld [vmem:[%s368_s0 + $0x60] sm:$0xff]   ;;  %v279_v10 = vld [vmem:[%s368_s0 + $0x68] sm:$0xff]  }
   0x4   :  { %244 = vmatprep.subr.bf16.mxu0 %v271_v2  ;;  %v276_v7 = vld [vmem:[%s368_s0 + $0x18] sm:$0xff]   ;;  %v278_v9 = vld [vmem:[%s368_s0 + $0x20] sm:$0xff]   ;;  %v280_v13 = vld [vmem:[%s368_s0 + $0x28] sm:$0xff]  }
   0x5   :  { %v15_v11 = vld [vmem:[%s369_s1] sm:$0xff]  ;;  %v281_v14 = vld [vmem:[%s368_s0 + $0x70] sm:$0xff]   ;;  %v283_v16 = vld [vmem:[%s368_s0 + $0x78] sm:$0xff]  }
   0x6   :  { %v225_v12 = vcombine.high %v15_v11, %v15_v11  ;;  %v282_v15 = vld [vmem:[%s368_s0 + $0x30] sm:$0xff]   ;;  %v284_v17 = vld [vmem:[%s368_s0 + $0x38] sm:$0xff]   ;;  %v224_v18 = vcombine.low %v15_v11, %v15_v11  ;;  %v205_v20 = vld [vmem:[%s370_s2] sm:$0xff] }
   0x7   :  { %245 = vmatpush3.bf16.msra.mxu0 %v272_v3  ;;  %208 = vperm.xlu1 %266, %v205_v20  }
   0x8   :  { %246 = vmatprep.subr.bf16.mxu0 %v273_v4  ;;  %183 = vmatprep.mubr.bf16.mxu0 %v225_v12 }
   0xb   :  { %247 = vmatpush3.bf16.msra.mxu0 %v274_v5  ;;  %267 = vset.pattern.permute.xlu1 %v290_v21 }
   0xc   :  { %248 = vmatprep.subr.bf16.mxu0 %v275_v6  ;;  %213 = vperm.xlu1 %267, %v205_v20  }
   0xf   :  { %249 = vmatpush3.bf16.msra.mxu0 %v276_v7 }
  0x10   :  { %250 = vmatprep.subr.bf16.mxu0 %v277_v8 }
  0x13   :  { %251 = vmatpush3.bf16.msra.mxu0 %v278_v9 }
  0x14   :  { %252 = vmatprep.subr.bf16.mxu0 %v279_v10 }
  0x17   :  { %253 = vmatpush3.bf16.msra.mxu0 %v280_v13 }
  0x18   :  { %254 = vmatprep.subr.bf16.mxu0 %v281_v14 }
  0x1b   :  { %255 = vmatpush3.bf16.msra.mxu0 %v282_v15 }
  0x1c   :  { %256 = vmatprep.subr.bf16.mxu0 %v283_v16 }
  0x1f   :  { %257 = vmatpush3.bf16.msra.mxu0 %v284_v17 }
  0x22   :  { %184 = vmatmul.mubr.bf16.vlgmr.msra.gmra.mrb[0].mxu0 %v224_v18 }
  0x86   :  { %v209_v36 = vpop.permute.xlu1 %208 }
  0x8b   :  { %v214_v40 = vpop.permute.xlu1 %213 }
  0xf5   :  { %v258_v22 = vpop.f32.mrb[0].mxu0 }
  0xf6   :  { %v259_v23 = vpop.f32.mrb[1].mxu0 }
  0xf7   :  { %v260_v24 = vadd.f32 %v259_v23, %v258_v22  ;;  %v261_v25 = vpop.f32.mrb[2].mxu0 }
  0xf8   :  { %v262_v26 = vpop.f32.mrb[3].mxu0 }
  0xf9   :  { %191 = vadd.xlane.f32.xlu0 %v260_v24  ;;  %v194_v27 = vmul.f32 %v260_v24, %v260_v24 }
  0xfd   :  { %195 = vadd.xlane.f32.xlu0 %v194_v27 }
 0x186   :  { %v192_v28 = vpop.xlane.xlu0 %191 }
 0x187   :  { %v193_v29 = vmul.f32 0.010204081, %v192_v28 }
 0x189   :  { %v198_v31 = vmul.f32 %v193_v29, %v193_v29  ;;  %v201_v37 = vsub.f32 %v260_v24, %v193_v29 }
 0x18a   :  { %v196_v30 = vpop.xlane.xlu0 %195 }
 0x18b   :  { %v197_v32 = vmul.f32 0.010204081, %v196_v30 }
 0x18d   :  { %v199_v33 = vsub.f32 %v197_v32, %v198_v31 }
 0x18f   :  { %v200_v34 = vmax.f32 %v199_v33, 0.0 }
 0x191   :  { %v202_v35 = vadd.f32 1e-05, %v200_v34 }
 0x193   :  { %287 = vrsqrt.f32 %v202_v35 }
 0x19d   :  { %v288_v38 = vpop.eup %287 }
 0x19e   :  { %v204_v39 = vmul.f32 %v288_v38, %v201_v37 }
 0x1a0   :  { %v211_v41 = vmul.f32 %v209_v36, %v204_v39 }
 0x1a2   :  { %v216_v42 = vadd.f32 %v214_v40, %v211_v41 }
 0x1a4   :  { %v217_v43 = vmax.f32 %v216_v42, 0.0 }
 0x1a6   :  { %v218_v44 = vpack.c.bf16 %v217_v43, %v217_v43 }
 0x1a8   :  { %219 = vst [vmem:[%s371_s3] sm:$0xf] %v218_v44 }

// kernel: autoencoder_forward.8
= control target key start
LH: loop header
LB: loop body
LE: loop exit
PB: predicated region body
PF: predicated region fallthrough
CT: control target
= control target key end

     0   :  { %v163_v0 = vmov 0.0   ;;  %vm164_vm0 = vmmov 0   ;;  %v165_v2 = vmov 0   ;;  %v166_v7 = vmov 1   ;;  %s211_s0 = inlined_call_operand.vmem [shape: bf16[80,128], index: 0, kind: input, shape index: {}]   ;;  %s212_s2 = inlined_call_operand.vmem [shape: f32[1,2], index: 2, kind: input, shape index: {}]   ;;  %s213_s1 = inlined_call_operand.vmem [shape: bf16[1,80], index: 1, kind: input, shape index: {}]   ;;  %s214_s3 = inlined_call_operand.vmem [shape: f32[1,128], index: 3, kind: output, shape index: {}]  }
   0x1   :  { %138 = vmatprep.subr.bf16.mxu0 %v163_v0  ;;  %v158_v1 = vld [vmem:[%s211_s0] sm:$0xff]   ;;  %148 = vmatprep.mubr.msk.bf16.mxu0 %vm164_vm0, %v163_v0  ;;  %v159_v3 = vld [vmem:[%s211_s0 + $0x8] sm:$0xff]   ;;  %v160_v5 = vld [vmem:[%s211_s0 + $0x10] sm:$0xff]   ;;  %vm56_vm1 = vcmask 654336   ;;  %v106_v10 = vlaneseq }
   0x2   :  { %156 = vset.pattern.permute.xlu0 %v165_v2  ;;  %139 = vmatpush3.bf16.msra.mxu0 %v158_v1  ;;  %v100_v4 = vld [vmem:[%s212_s2] sm:$0x1]  ;;  %v161_v6 = vld [vmem:[%s211_s0 + $0x18] sm:$0xff]  }
   0x3   :  { %140 = vmatprep.subr.bf16.mxu0 %v163_v0  ;;  %103 = vperm.xlu0 %156, %v100_v4   ;;  %v162_v8 = vld [vmem:[%s211_s0 + $0x20] sm:$0xff]   ;;  %v107_v12 = vshrl.u32 %v106_v10, 7 }
   0x4   :  { %v15_v9 = vld [vmem:[%s213_s1] sm:$0x1] }
   0x5   :  { %v108_v13 = vsub.s32 0, %v107_v12 }
   0x6   :  { %141 = vmatpush3.bf16.msra.mxu0 %v159_v3 }
   0x7   :  { %142 = vmatprep.subr.bf16.mxu0 %v163_v0  ;;  %157 = vset.pattern.permute.xlu0 %v166_v7 }
   0x8   :  { %112 = vperm.xlu0 %157, %v100_v4  }
   0xa   :  { %143 = vmatpush3.bf16.msra.mxu0 %v160_v5 }
   0xb   :  { %144 = vmatprep.subr.bf16.mxu0 %v163_v0 }
   0xe   :  { %145 = vmatpush3.bf16.msra.mxu0 %v161_v6 }
   0xf   :  { %146 = vmatprep.subr.bf16.mxu0 %v163_v0 }
  0x12   :  { %147 = vmatpush3.bf16.msra.mxu0 %v162_v8 }
  0x15   :  { %149 = vmatmul.mubr.msk.bf16.vlgmr.msra.gmra.mrb[0].mxu0 %vm56_vm1, %v15_v9 }
  0x82   :  { %v104_v11 = vpop.permute.xlu0 %103 }
  0x83   :  { %v109_v15 = vrot.slane %v104_v11, %v108_v13 }
  0x87   :  { %v113_v14 = vpop.permute.xlu0 %112 }
  0x88   :  { %v118_v16 = vrot.slane %v113_v14, %v108_v13 }
  0xe8   :  { %v94_v17 = vpop.f32.mrb[0].mxu0 }
  0xe9   :  { %v110_v18 = vmul.f32 %v109_v15, %v94_v17  ;;  %v150_v19 = vpop.f32.mrb[1].mxu0 }
  0xea   :  { %v97_v20 = vpop.f32.mrb[2].mxu0 }
  0xeb   :  { %v119_v21 = vadd.f32 %v118_v16, %v110_v18  ;;  %v151_v22 = vpop.f32.mrb[3].mxu0 }
  0xed   :  { %v120_v23 = vmax.f32 %v119_v21, 0.0 }
  0xef   :  { %121 = vst [vmem:[%s214_s3] sm:$0x1] %v120_v23 }

// kernel: autoencoder_forward.10
= control target key start
LH: loop header
LB: loop body
LE: loop exit
PB: predicated region body
PF: predicated region fallthrough
CT: control target
= control target key end

     0   :  { %v503_v1 = vmov 0   ;;  %vm83_vm0 = vcmask 654336   ;;  %v504_v12 = vmov 1   ;;  %s670_s0 = inlined_call_operand.vmem [shape: bf16[80,128], index: 0, kind: input, shape index: {}]   ;;  %s671_s1 = inlined_call_operand.vmem [shape: bf16[64,80], index: 1, kind: input, shape index: {}]   ;;  %s672_s2 = inlined_call_operand.vmem [shape: f32[64,2], index: 2, kind: input, shape index: {}]   ;;  %s673_s3 = inlined_call_operand.vmem [shape: bf16[64,128], index: 3, kind: output, shape index: {}]  }
   0x1   :  { %v490_v0 = vld [vmem:[%s670_s0] sm:$0xff]   ;;  %487 = vset.pattern.permute.xlu1 %v503_v1  ;;  %486 = vset.pattern.permute.xlu0 %v503_v1  ;;  %v491_v2 = vld [vmem:[%s670_s0 + $0x8] sm:$0xff]   ;;  %v492_v3 = vld [vmem:[%s670_s0 + $0x10] sm:$0xff]  }
   0x2   :  { %456 = vmatprep.subr.bf16.mxu0 %v490_v0  ;;  %474 = vmatprep.subr.bf16.mxu1 %v490_v0  ;;  %v495_v4 = vld [vmem:[%s671_s1] sm:$0xff]   ;;  %v496_v5 = vld [vmem:[%s671_s1 + $0x10] sm:$0xff]   ;;  %v493_v6 = vld [vmem:[%s670_s0 + $0x18] sm:$0xff]  }
   0x3   :  { %457 = vmatpush3.bf16.msra.mxu0 %v490_v0  ;;  %479 = vmatpush3.bf16.msra.mxu1 %v490_v0  ;;  %v236_v7 = vld [vmem:[%s672_s2 + $0x8] sm:$0xff]  ;;  %v275_v8 = vld [vmem:[%s672_s2 + $0x10] sm:$0xff]  ;;  %v494_v9 = vld [vmem:[%s670_s0 + $0x20] sm:$0xff]  }
   0x4   :  { %458 = vmatprep.subr.bf16.mxu0 %v491_v2  ;;  %475 = vmatprep.subr.bf16.mxu1 %v491_v2  ;;  %v235_v10 = vld [vmem:[%s672_s2] sm:$0xff]  ;;  %v276_v11 = vld [vmem:[%s672_s2 + $0x18] sm:$0xff]  ;;  %v497_v13 = vld [vmem:[%s671_s1 + $0x8] sm:$0xff]  }
   0x5   :  { %466 = vmatprep.mubr.msk.bf16.mxu0 %vm83_vm0, %v495_v4  ;;  %470 = vmatprep.mubr.msk.bf16.mxu1 %vm83_vm0, %v496_v5  ;;  %v498_v14 = vld [vmem:[%s671_s1 + $0x18] sm:$0xff]   ;;  %v315_v15 = vld [vmem:[%s672_s2 + $0x20] sm:$0xff]  ;;  %v316_v16 = vld [vmem:[%s672_s2 + $0x28] sm:$0xff] }
   0x6   :  { %244 = vperm.xlu1 %487, %v236_v7   ;;  %239 = vperm.xlu0 %486, %v235_v10   ;;  %v355_v17 = vld [vmem:[%s672_s2 + $0x30] sm:$0xff]  ;;  %v356_v18 = vld [vmem:[%s672_s2 + $0x38] sm:$0xff] }
   0x7   :  { %459 = vmatpush3.bf16.msra.mxu0 %v491_v2  ;;  %480 = vmatpush3.bf16.msra.mxu1 %v491_v2 }
   0x8   :  { %460 = vmatprep.subr.bf16.mxu0 %v492_v3  ;;  %476 = vmatprep.subr.bf16.mxu1 %v492_v3 }
   0xa   :  { %279 = vperm.xlu1 %487, %v275_v8   ;;  %489 = vset.pattern.permute.xlu0 %v504_v12 }
   0xb   :  { %461 = vmatpush3.bf16.msra.mxu0 %v492_v3  ;;  %481 = vmatpush3.bf16.msra.mxu1 %v492_v3 }
   0xc   :  { %462 = vmatprep.subr.bf16.mxu0 %v493_v6  ;;  %477 = vmatprep.subr.bf16.mxu1 %v493_v6 }
   0xd   :  { %254 = vperm.xlu0 %489, %v236_v7  }
   0xe   :  { %284 = vperm.xlu1 %487, %v276_v11  }
   0xf   :  { %463 = vmatpush3.bf16.msra.mxu0 %v493_v6  ;;  %482 = vmatpush3.bf16.msra.mxu1 %v493_v6 }
  0x10   :  { %464 = vmatprep.subr.bf16.mxu0 %v494_v9  ;;  %478 = vmatprep.subr.bf16.mxu1 %v494_v9 }
  0x12   :  { %319 = vperm.xlu1 %487, %v315_v15  }
  0x13   :  { %465 = vmatpush3.bf16.msra.mxu0 %v494_v9  ;;  %483 = vmatpush3.bf16.msra.mxu1 %v494_v9 }
  0x16   :  { %467 = vmatmul.mubr.msk.bf16.vlgmr.msra.gmra.mrb[0].mxu0 %vm83_vm0, %v497_v13  ;;  %471 = vmatmul.mubr.msk.bf16.vlgmr.msra.gmra.mrb[0].mxu1 %vm83_vm0, %v498_v14 }
  0x17   :  { %324 = vperm.xlu1 %487, %v316_v16  }
  0x1b   :  { %359 = vperm.xlu1 %487, %v355_v17  }
  0x1f   :  { %364 = vperm.xlu1 %487, %v356_v18  }
  0x23   :  { %488 = vset.pattern.permute.xlu1 %v504_v12 }
  0x24   :  { %250 = vperm.xlu1 %488, %v235_v10  }
  0x28   :  { %290 = vperm.xlu1 %488, %v275_v8  }
  0x2c   :  { %294 = vperm.xlu1 %488, %v276_v11  }
  0x85   :  { %v620_v35 = vpop.permute.xlu1 %244  ;;  %v630_v41 = vpop.permute.xlu0 %239 }
  0x89   :  { %v280_v36 = vpop.permute.xlu1 %279 }
  0x8c   :  { %v634_v43 = vpop.permute.xlu0 %254 }
  0x8d   :  { %v622_v37 = vpop.permute.xlu1 %284 }
  0x91   :  { %v624_v38 = vpop.permute.xlu1 %319 }
  0x96   :  { %v626_v39 = vpop.permute.xlu1 %324 }
  0x9a   :  { %v628_v40 = vpop.permute.xlu1 %359 }
  0x9e   :  { %v632_v42 = vpop.permute.xlu1 %364 }
  0xa3   :  { %v636_v44 = vpop.permute.xlu1 %250 }
  0xa7   :  { %v291_v46 = vpop.permute.xlu1 %290 }
  0xab   :  { %v638_v49 = vpop.permute.xlu1 %294 }
  0xe9   :  { %v580_v19 = vpop.f32.mrb[0].mxu0  ;;  %v582_v20 = vpop.f32.mrb[0].mxu1 }
  0xea   :  { %203 = vadd.xlane.f32.xlu0 %v582_v20  ;;  %v585_v21 = vpop.f32.mrb[1].mxu1  ;;  %175 = vadd.xlane.f32.xlu1 %v580_v19  ;;  %v588_v22 = vpop.f32.mrb[1].mxu0  ;;  %v181_v28 = vmul.f32 %v580_v19, %v580_v19  ;;  %v209_v29 = vmul.f32 %v582_v20, %v582_v20 }
  0xeb   :  { %v590_v23 = vpop.f32.mrb[2].mxu0  ;;  %v592_v24 = vpop.f32.mrb[2].mxu1  ;;  %v167_v27 = vmul.f32 %v588_v22, %v588_v22  ;;  %v195_v30 = vmul.f32 %v585_v21, %v585_v21 }
  0xec   :  { %v594_v25 = vpop.f32.mrb[3].mxu0  ;;  %v596_v26 = vpop.f32.mrb[3].mxu1  ;;  %v182_v31 = vmul.f32 %v590_v23, %v590_v23  ;;  %v210_v32 = vmul.f32 %v592_v24, %v592_v24 }
  0xed   :  { %v168_v33 = vmul.f32 %v594_v25, %v594_v25  ;;  %v196_v34 = vmul.f32 %v596_v26, %v596_v26 }
  0xee   :  { %205 = vadd.xlane.f32.xlu1 %v592_v24  ;;  %161 = vadd.xlane.f32.xlu0 %v588_v22 }
  0xf2   :  { %189 = vadd.xlane.f32.xlu0 %v585_v21  ;;  %169 = vadd.xlane.f32.xlu1 %v167_v27 }
  0xf6   :  { %191 = vadd.xlane.f32.xlu1 %v596_v26  ;;  %177 = vadd.xlane.f32.xlu0 %v590_v23 }
  0xfa   :  { %183 = vadd.xlane.f32.xlu0 %v181_v28 }
  0xfe   :  { %211 = vadd.xlane.f32.xlu0 %v209_v29 }
 0x102   :  { %163 = vadd.xlane.f32.xlu0 %v594_v25 }
 0x106   :  { %197 = vadd.xlane.f32.xlu0 %v195_v30 }
 0x107   :  { %334 = vperm.xlu1 %488, %v316_v16  }
 0x11c   :  { %330 = vperm.xlu0 %489, %v315_v15  }
 0x120   :  { %370 = vperm.xlu0 %489, %v355_v17  }
 0x12b   :  { %185 = vadd.xlane.f32.xlu1 %v182_v31 }
 0x12f   :  { %213 = vadd.xlane.f32.xlu1 %v210_v32 }
 0x133   :  { %171 = vadd.xlane.f32.xlu1 %v168_v33 }
 0x137   :  { %199 = vadd.xlane.f32.xlu1 %v196_v34 }
 0x148   :  { %374 = vperm.xlu1 %488, %v356_v18  }
 0x177   :  { %v204_v45 = vpop.xlane.xlu0 %203  ;;  %v176_v51 = vpop.xlane.xlu1 %175 }
 0x17b   :  { %v162_v47 = vpop.xlane.xlu0 %161  ;;  %v206_v54 = vpop.xlane.xlu1 %205 }
 0x17c   :  { %v179_v53 = vadd.f32 %v176_v51, %v162_v47 }
 0x17f   :  { %v190_v48 = vpop.xlane.xlu0 %189  ;;  %v170_v59 = vpop.xlane.xlu1 %169 }
 0x180   :  { %v193_v56 = vadd.f32 %v190_v48, %v179_v53 }
 0x182   :  { %v207_v58 = vadd.f32 %v204_v45, %v193_v56 }
 0x183   :  { %v178_v50 = vpop.xlane.xlu0 %177  ;;  %v192_v10 = vpop.xlane.xlu1 %191 }
 0x184   :  { %v217_v62 = vmul.f32 0.0025510204, %v207_v58 }
 0x186   :  { %v221_v1 = vmul.f32 %v217_v62, %v217_v62  ;;  %v271_v6 = vsub.f32 %v580_v19, %v217_v62  ;;  %v351_v47 = vsub.f32 %v582_v20, %v217_v62 }
 0x187   :  { %v184_v52 = vpop.xlane.xlu0 %183  ;;  %v335_v12 = vpop.permute.xlu1 %334 }
 0x188   :  { %v187_v60 = vadd.f32 %v184_v52, %v170_v59 }
 0x18b   :  { %v212_v55 = vpop.xlane.xlu0 %211 }
 0x18f   :  { %v164_v57 = vpop.xlane.xlu0 %163 }
 0x190   :  { %v180_v14 = vadd.f32 %v178_v50, %v164_v57 }
 0x192   :  { %v194_v16 = vadd.f32 %v192_v10, %v180_v14 }
 0x193   :  { %v198_v61 = vpop.xlane.xlu0 %197 }
 0x194   :  { %v201_v63 = vadd.f32 %v198_v61, %v187_v60  ;;  %v208_v18 = vadd.f32 %v206_v54, %v194_v16 }
 0x196   :  { %v215_v0 = vadd.f32 %v212_v55, %v201_v63  ;;  %v218_v29 = vmul.f32 0.0025510204, %v208_v18 }
 0x198   :  { %v219_v2 = vmul.f32 0.0025510204, %v215_v0  ;;  %v222_v32 = vmul.f32 %v218_v29, %v218_v29  ;;  %v232_v56 = vsub.f32 %v594_v25, %v218_v29  ;;  %v272_v57 = vsub.f32 %v590_v23, %v218_v29 }
 0x19a   :  { %v223_v3 = vsub.f32 %v219_v2, %v221_v1 }
 0x19b   :  { %v331_v52 = vpop.permute.xlu0 %330 }
 0x19c   :  { %v225_v4 = vmax.f32 %v223_v3, 0.0 }
 0x19e   :  { %v227_v5 = vadd.f32 1e-05, %v225_v4 }
 0x19f   :  { %v371_v20 = vpop.permute.xlu0 %370 }
 0x1a0   :  { %499 = vrsqrt.f32 %v227_v5 }
 0x1aa   :  { %v500_v7 = vpop.eup %499 }
 0x1ab   :  { %v273_v8 = vmul.f32 %v500_v7, %v271_v6  ;;  %v353_v50 = vmul.f32 %v500_v7, %v351_v47 }
 0x1ad   :  { %v287_v9 = vmul.f32 %v280_v36, %v273_v8  ;;  %v231_v36 = vsub.f32 %v588_v22, %v217_v62  ;;  %v367_v54 = vmul.f32 %v628_v40, %v353_v50  ;;  %v312_v22 = vsub.f32 %v596_v26, %v218_v29 }
 0x1af   :  { %v297_v11 = vadd.f32 %v291_v46, %v287_v9  ;;  %v311_v46 = vsub.f32 %v585_v21, %v217_v62  ;;  %v233_v51 = vmul.f32 %v500_v7, %v231_v36  ;;  %v352_v21 = vsub.f32 %v592_v24, %v218_v29 }
 0x1b1   :  { %v313_v48 = vmul.f32 %v500_v7, %v311_v46  ;;  %v247_v55 = vmul.f32 %v630_v41, %v233_v51  ;;  %v299_v7 = vmax.f32 %v297_v11, 0.0 }
 0x1b3   :  { %v327_v53 = vmul.f32 %v624_v38, %v313_v48  ;;  %v377_v38 = vadd.f32 %v371_v20, %v367_v54  ;;  %v257_v40 = vadd.f32 %v636_v44, %v247_v55 }
 0x1b5   :  { %v337_v63 = vadd.f32 %v331_v52, %v327_v53  ;;  %v379_v5 = vmax.f32 %v377_v38, 0.0  ;;  %v259_v6 = vmax.f32 %v257_v40, 0.0 }
 0x1b7   :  { %v339_v4 = vmax.f32 %v337_v63, 0.0 }
 0x1b8   :  { %v186_v13 = vpop.xlane.xlu1 %185 }
 0x1bc   :  { %v214_v15 = vpop.xlane.xlu1 %213 }
 0x1c0   :  { %v172_v17 = vpop.xlane.xlu1 %171 }
 0x1c1   :  { %v188_v27 = vadd.f32 %v186_v13, %v172_v17 }
 0x1c4   :  { %v200_v28 = vpop.xlane.xlu1 %199 }
 0x1c5   :  { %v202_v30 = vadd.f32 %v200_v28, %v188_v27 }
 0x1c7   :  { %v216_v31 = vadd.f32 %v214_v15, %v202_v30 }
 0x1c8   :  { %v375_v0 = vpop.permute.xlu1 %374 }
 0x1c9   :  { %v220_v33 = vmul.f32 0.0025510204, %v216_v31 }
 0x1cb   :  { %v224_v19 = vsub.f32 %v220_v33, %v222_v32 }
 0x1cd   :  { %v226_v34 = vmax.f32 %v224_v19, 0.0 }
 0x1cf   :  { %v228_v45 = vadd.f32 1e-05, %v226_v34 }
 0x1d1   :  { %501 = vrsqrt.f32 %v228_v45 }
 0x1db   :  { %v502_v58 = vpop.eup %501 }
 0x1dc   :  { %v234_v59 = vmul.f32 %v502_v58, %v232_v56  ;;  %v274_v60 = vmul.f32 %v502_v58, %v272_v57  ;;  %v314_v61 = vmul.f32 %v502_v58, %v312_v22  ;;  %v354_v62 = vmul.f32 %v502_v58, %v352_v21 }
 0x1de   :  { %v248_v41 = vmul.f32 %v620_v35, %v234_v59  ;;  %v288_v25 = vmul.f32 %v622_v37, %v274_v60  ;;  %v328_v23 = vmul.f32 %v626_v39, %v314_v61  ;;  %v368_v26 = vmul.f32 %v632_v42, %v354_v62 }
 0x1e0   :  { %v258_v24 = vadd.f32 %v634_v43, %v248_v41  ;;  %v298_v1 = vadd.f32 %v638_v49, %v288_v25  ;;  %v338_v2 = vadd.f32 %v335_v12, %v328_v23  ;;  %v378_v3 = vadd.f32 %v375_v0, %v368_v26 }
 0x1e2   :  { %v260_v44 = vmax.f32 %v258_v24, 0.0  ;;  %v300_v8 = vmax.f32 %v298_v1, 0.0  ;;  %v340_v35 = vmax.f32 %v338_v2, 0.0  ;;  %v380_v9 = vmax.f32 %v378_v3, 0.0 }
 0x1e4   :  { %v427_v37 = vpack.c.bf16 %v260_v44, %v259_v6  ;;  %v432_v10 = vpack.c.bf16 %v300_v8, %v299_v7  ;;  %v437_v39 = vpack.c.bf16 %v340_v35, %v339_v4  ;;  %v442_v13 = vpack.c.bf16 %v380_v9, %v379_v5 }
 0x1e6   :  { %428 = vst [vmem:[%s673_s3] sm:$0xff] %v427_v37   ;;  %444 = vst [vmem:[%s673_s3 + $0x8] sm:$0xff] %v432_v10  }
 0x1e7   :  { %445 = vst [vmem:[%s673_s3 + $0x10] sm:$0xff] %v437_v39   ;;  %446 = vst [vmem:[%s673_s3 + $0x18] sm:$0xff] %v442_v13  }

// kernel: autoencoder_forward.9
= control target key start
LH: loop header
LB: loop body
LE: loop exit
PB: predicated region body
PF: predicated region fallthrough
CT: control target
= control target key end

     0   :  { %v121_v0 = vmov 0.0   ;;  %vm122_vm0 = vmmov 0   ;;  %vm24_vm1 = vcmask 130048   ;;  %v123_v3 = vmov 0   ;;  %s157_s0 = inlined_call_operand.vmem [shape: bf16[16,128], index: 0, kind: input, shape index: {}]   ;;  %s158_s1 = inlined_call_operand.vmem [shape: bf16[8,16], index: 1, kind: input, shape index: {}]   ;;  %s159_s2 = inlined_call_operand.vmem [shape: f32[8,2], index: 2, kind: input, shape index: {}]   ;;  %s160_s3 = inlined_call_operand.vmem [shape: bf16[8,128], index: 3, kind: output, shape index: {}]  }
   0x1   :  { %105 = vmatprep.subr.bf16.mxu0 %v121_v0  ;;  %v118_v1 = vld [vmem:[%s157_s0] sm:$0xff]   ;;  %107 = vmatprep.mubr.msk.bf16.mxu0 %vm122_vm0, %v121_v0  ;;  %v124_v5 = vmov 1  }
   0x2   :  { %106 = vmatpush3.bf16.msra.mxu0 %v118_v1  ;;  %v15_v2 = vld [vmem:[%s158_s1] sm:$0xf]  ;;  %115 = vset.pattern.permute.xlu1 %v123_v3 }
   0x3   :  { %v82_v4 = vld [vmem:[%s159_s2] sm:$0xff]  ;;  %117 = vset.pattern.permute.xlu0 %v124_v5 }
   0x4   :  { %85 = vperm.xlu1 %115, %v82_v4  }
   0x5   :  { %108 = vmatmul.mubr.msk.bf16.vlgmr.msra.gmra.mrb[0].mxu0 %vm24_vm1, %v15_v2 }
   0x8   :  { %116 = vset.pattern.permute.xlu1 %v124_v5 }
   0x9   :  { %90 = vperm.xlu1 %116, %v82_v4  }
  0x83   :  { %v86_v19 = vpop.permute.xlu1 %85 }
  0x88   :  { %v91_v23 = vpop.permute.xlu1 %90 }
  0xd8   :  { %v62_v6 = vpop.f32.mrb[0].mxu0 }
  0xd9   :  { %68 = vadd.xlane.f32.xlu0 %v62_v6  ;;  %v109_v7 = vpop.f32.mrb[1].mxu0  ;;  %v71_v10 = vmul.f32 %v62_v6, %v62_v6 }
  0xda   :  { %v65_v8 = vpop.f32.mrb[2].mxu0 }
  0xdb   :  { %v110_v9 = vpop.f32.mrb[3].mxu0 }
  0xdd   :  { %72 = vadd.xlane.f32.xlu0 %v71_v10 }
 0x166   :  { %v69_v11 = vpop.xlane.xlu0 %68 }
 0x167   :  { %v70_v12 = vmul.f32 0.010204081, %v69_v11 }
 0x169   :  { %v75_v14 = vmul.f32 %v70_v12, %v70_v12  ;;  %v78_v20 = vsub.f32 %v62_v6, %v70_v12 }
 0x16a   :  { %v73_v13 = vpop.xlane.xlu0 %72 }
 0x16b   :  { %v74_v15 = vmul.f32 0.010204081, %v73_v13 }
 0x16d   :  { %v76_v16 = vsub.f32 %v74_v15, %v75_v14 }
 0x16f   :  { %v77_v17 = vmax.f32 %v76_v16, 0.0 }
 0x171   :  { %v79_v18 = vadd.f32 1e-05, %v77_v17 }
 0x173   :  { %119 = vrsqrt.f32 %v79_v18 }
 0x17d   :  { %v120_v21 = vpop.eup %119 }
 0x17e   :  { %v81_v22 = vmul.f32 %v120_v21, %v78_v20 }
 0x180   :  { %v88_v24 = vmul.f32 %v86_v19, %v81_v22 }
 0x182   :  { %v93_v25 = vadd.f32 %v91_v23, %v88_v24 }
 0x184   :  { %v94_v26 = vmax.f32 %v93_v25, 0.0 }
 0x186   :  { %v95_v27 = vpack.c.bf16 %v94_v26, %v94_v26 }
 0x188   :  { %96 = vst [vmem:[%s160_s3] sm:$0xf] %v95_v27 }

// kernel: autoencoder_forward.11
= control target key start
LH: loop header
LB: loop body
LE: loop exit
PB: predicated region body
PF: predicated region fallthrough
CT: control target
= control target key end

     0   :  { %v501_v1 = vmov 0   ;;  %vm242_vm0 = vcmask 130048   ;;  %v502_v38 = vmov 1   ;;  %s643_s0 = inlined_call_operand.vmem [shape: bf16[144,512], index: 0, kind: input, shape index: {}]   ;;  %s644_s1 = inlined_call_operand.vmem [shape: bf16[4,144], index: 1, kind: input, shape index: {}]   ;;  %s645_s2 = inlined_call_operand.vmem [shape: f32[4,2], index: 2, kind: input, shape index: {}]   ;;  %s646_s3 = inlined_call_operand.vmem [shape: f32[4,512], index: 3, kind: output, shape index: {}]  }
   0x1   :  { %v431_v0 = vld [vmem:[%s643_s0 + $0x4] ss:$16 sps:$4 sm:$0xff]   ;;  %429 = vset.pattern.permute.xlu0 %v501_v1  ;;  %v433_v2 = vld [vmem:[%s643_s0 + $0xc] ss:$16 sps:$4 sm:$0xff]   ;;  %v435_v3 = vld [vmem:[%s643_s0] ss:$16 sps:$4 sm:$0xff]  }
   0x2   :  { %246 = vmatprep.subr.bf16.mxu0 %v431_v0  ;;  %v436_v4 = vld [vmem:[%s643_s0 + $0x8] ss:$16 sps:$4 sm:$0xff]   ;;  %287 = vmatprep.subr.bf16.mxu1 %v433_v2  ;;  %v437_v5 = vld [vmem:[%s643_s0 + $0x24] ss:$16 sps:$4 sm:$0xff]   ;;  %v439_v6 = vld [vmem:[%s643_s0 + $0x2c] ss:$16 sps:$4 sm:$0xff]  }
   0x3   :  { %247 = vmatpush1.bf16.msra.mxu0 %v435_v3  ;;  %288 = vmatpush1.bf16.msra.mxu1 %v436_v4  ;;  %v441_v7 = vld [vmem:[%s643_s0 + $0x20] ss:$16 sps:$4 sm:$0xff]   ;;  %v442_v8 = vld [vmem:[%s643_s0 + $0x28] ss:$16 sps:$4 sm:$0xff]   ;;  %v443_v9 = vld [vmem:[%s643_s0 + $0x44] ss:$16 sps:$4 sm:$0xff]  }
   0x4   :  { %248 = vmatprep.subr.bf16.mxu0 %v437_v5  ;;  %289 = vmatprep.subr.bf16.mxu1 %v439_v6  ;;  %v445_v10 = vld [vmem:[%s643_s0 + $0x4c] ss:$16 sps:$4 sm:$0xff]   ;;  %v447_v11 = vld [vmem:[%s643_s0 + $0x40] ss:$16 sps:$4 sm:$0xff]   ;;  %v448_v12 = vld [vmem:[%s643_s0 + $0x48] ss:$16 sps:$4 sm:$0xff]  }
   0x5   :  { %v449_v13 = vld [vmem:[%s643_s0 + $0x64] ss:$16 sps:$4 sm:$0xff]   ;;  %v451_v14 = vld [vmem:[%s643_s0 + $0x6c] ss:$16 sps:$4 sm:$0xff]   ;;  %v453_v15 = vld [vmem:[%s643_s0 + $0x60] ss:$16 sps:$4 sm:$0xff]  }
   0x6   :  { %v454_v16 = vld [vmem:[%s643_s0 + $0x68] ss:$16 sps:$4 sm:$0xff]   ;;  %v455_v17 = vld [vmem:[%s643_s0 + $0x84] ss:$16 sps:$4 sm:$0xff]   ;;  %v457_v18 = vld [vmem:[%s643_s0 + $0x8c] ss:$16 sps:$4 sm:$0xff]  }
   0x7   :  { %249 = vmatpush1.bf16.msra.mxu0 %v441_v7  ;;  %290 = vmatpush1.bf16.msra.mxu1 %v442_v8  ;;  %v459_v19 = vld [vmem:[%s643_s0 + $0x80] ss:$16 sps:$4 sm:$0xff]   ;;  %v460_v20 = vld [vmem:[%s643_s0 + $0x88] ss:$16 sps:$4 sm:$0xff]   ;;  %v461_v21 = vld [vmem:[%s643_s0 + $0xa4] ss:$16 sps:$4 sm:$0xff]  }
   0x8   :  { %250 = vmatprep.subr.bf16.mxu0 %v443_v9  ;;  %291 = vmatprep.subr.bf16.mxu1 %v445_v10  ;;  %v463_v22 = vld [vmem:[%s643_s0 + $0xac] ss:$16 sps:$4 sm:$0xff]   ;;  %v465_v23 = vld [vmem:[%s643_s0 + $0xa0] ss:$16 sps:$4 sm:$0xff]   ;;  %v466_v24 = vld [vmem:[%s643_s0 + $0xa8] ss:$16 sps:$4 sm:$0xff]  }
   0x9   :  { %v467_v25 = vld [vmem:[%s643_s0 + $0xc4] ss:$16 sps:$4 sm:$0xff]   ;;  %v469_v26 = vld [vmem:[%s643_s0 + $0xcc] ss:$16 sps:$4 sm:$0xff]   ;;  %v471_v27 = vld [vmem:[%s643_s0 + $0xc0] ss:$16 sps:$4 sm:$0xff]  }
   0xa   :  { %v472_v28 = vld [vmem:[%s643_s0 + $0xc8] ss:$16 sps:$4 sm:$0xff]   ;;  %v384_v29 = vld.sshfl [vmem:[%s644_s1] sm:$0x33 pattern:$0x76325410] }
   0xb   :  { %251 = vmatpush1.bf16.msra.mxu0 %v447_v11  ;;  %292 = vmatpush1.bf16.msra.mxu1 %v448_v12  ;;  %v328_v30 = vld [vmem:[%s645_s2] sm:$0xf]  ;;  %v473_v31 = vld [vmem:[%s643_s0 + $0xe4] ss:$16 sps:$4 sm:$0xff]   ;;  %v475_v32 = vld [vmem:[%s643_s0 + $0xec] ss:$16 sps:$4 sm:$0xff]   ;;  %v60_v33 = vcombine.high %v384_v29, %v384_v29 }
   0xc   :  { %252 = vmatprep.subr.bf16.mxu0 %v449_v13  ;;  %293 = vmatprep.subr.bf16.mxu1 %v451_v14  ;;  %v477_v34 = vld [vmem:[%s643_s0 + $0xe0] ss:$16 sps:$4 sm:$0xff]   ;;  %v478_v35 = vld [vmem:[%s643_s0 + $0xe8] ss:$16 sps:$4 sm:$0xff]   ;;  %v479_v36 = vld [vmem:[%s643_s0 + $0x104] ss:$16 sps:$4 sm:$0xff]  }
   0xd   :  { %331 = vperm.xlu0 %429, %v328_v30   ;;  %421 = vmatprep.mubr.msk.bf16.mxu0 %vm242_vm0, %v60_v33  ;;  %v481_v37 = vld [vmem:[%s643_s0 + $0x10c] ss:$16 sps:$4 sm:$0xff]   ;;  %v483_v39 = vld [vmem:[%s643_s0 + $0x100] ss:$16 sps:$4 sm:$0xff]   ;;  %v484_v40 = vld [vmem:[%s643_s0 + $0x108] ss:$16 sps:$4 sm:$0xff]  }
   0xe   :  { %422 = vmatprep.mubr.msk.bf16.mxu1 %vm242_vm0, %v60_v33 }
   0xf   :  { %253 = vmatpush1.bf16.msra.mxu0 %v453_v15  ;;  %294 = vmatpush1.bf16.msra.mxu1 %v454_v16 }
  0x10   :  { %254 = vmatprep.subr.bf16.mxu0 %v455_v17  ;;  %295 = vmatprep.subr.bf16.mxu1 %v457_v18 }
  0x11   :  { %430 = vset.pattern.permute.xlu0 %v502_v38 }
  0x12   :  { %339 = vperm.xlu0 %430, %v328_v30  }
  0x13   :  { %255 = vmatpush1.bf16.msra.mxu0 %v459_v19  ;;  %296 = vmatpush1.bf16.msra.mxu1 %v460_v20 }
  0x14   :  { %256 = vmatprep.subr.bf16.mxu0 %v461_v21  ;;  %297 = vmatprep.subr.bf16.mxu1 %v463_v22 }
  0x17   :  { %257 = vmatpush1.bf16.msra.mxu0 %v465_v23  ;;  %298 = vmatpush1.bf16.msra.mxu1 %v466_v24 }
  0x18   :  { %258 = vmatprep.subr.bf16.mxu0 %v467_v25  ;;  %299 = vmatprep.subr.bf16.mxu1 %v469_v26 }
  0x1b   :  { %259 = vmatpush1.bf16.msra.mxu0 %v471_v27  ;;  %300 = vmatpush1.bf16.msra.mxu1 %v472_v28 }
  0x1c   :  { %260 = vmatprep.subr.bf16.mxu0 %v473_v31  ;;  %301 = vmatprep.subr.bf16.mxu1 %v475_v32 }
  0x1f   :  { %261 = vmatpush1.bf16.msra.mxu0 %v477_v34  ;;  %302 = vmatpush1.bf16.msra.mxu1 %v478_v35 }
  0x20   :  { %262 = vmatprep.subr.bf16.mxu0 %v479_v36  ;;  %303 = vmatprep.subr.bf16.mxu1 %v481_v37 }
  0x23   :  { %263 = vmatpush1.bf16.msra.mxu0 %v483_v39  ;;  %304 = vmatpush1.bf16.msra.mxu1 %v484_v40 }
  0x26   :  { %279 = vmatmul.mubr.bf16.vlgmr.msra.gmra.mrb[0].mxu0 %v384_v29  ;;  %320 = vmatmul.mubr.bf16.vlgmr.msra.gmra.mrb[0].mxu1 %v384_v29 }
  0x8c   :  { %v332_v41 = vpop.permute.xlu0 %331 }
  0x91   :  { %v340_v42 = vpop.permute.xlu0 %339 }
  0xf9   :  { %v280_v43 = vpop.f32.mrb[0].mxu0  ;;  %v321_v44 = vpop.f32.mrb[0].mxu1 }
  0xfa   :  { %v334_v45 = vmul.f32 %v332_v41, %v280_v43  ;;  %v336_v46 = vmul.f32 %v332_v41, %v321_v44  ;;  %v282_v47 = vpop.f32.mrb[1].mxu0  ;;  %v323_v48 = vpop.f32.mrb[1].mxu1 }
  0xfb   :  { %v335_v49 = vmul.f32 %v332_v41, %v282_v47  ;;  %v337_v50 = vmul.f32 %v332_v41, %v323_v48  ;;  %v284_v51 = vpop.f32.mrb[2].mxu0  ;;  %v325_v52 = vpop.f32.mrb[2].mxu1 }
  0xfc   :  { %v342_v53 = vadd.f32 %v340_v42, %v334_v45  ;;  %v344_v54 = vadd.f32 %v340_v42, %v336_v46  ;;  %v285_v55 = vpop.f32.mrb[3].mxu0  ;;  %v326_v56 = vpop.f32.mrb[3].mxu1 }
  0xfd   :  { %v343_v57 = vadd.f32 %v340_v42, %v335_v49  ;;  %v345_v58 = vadd.f32 %v340_v42, %v337_v50 }
  0xfe   :  { %v423_v59 = vmul.f32 -1.442695, %v342_v53  ;;  %v425_v60 = vmul.f32 -1.442695, %v344_v54 }
  0xff   :  { %v424_v61 = vmul.f32 -1.442695, %v343_v57  ;;  %v426_v62 = vmul.f32 -1.442695, %v345_v58 }
 0x100   :  { %485 = vpow2.f32 %v423_v59 }
 0x101   :  { %487 = vpow2.f32 %v424_v61 }
 0x102   :  { %489 = vpow2.f32 %v425_v60 }
 0x103   :  { %491 = vpow2.f32 %v426_v62 }
 0x10a   :  { %v486_v63 = vpop.eup %485 }
 0x10b   :  { %v488_v0 = vpop.eup %487  ;;  %v358_v1 = vadd.f32 1.0, %v486_v63 }
 0x10c   :  { %v490_v2 = vpop.eup %489  ;;  %v359_v3 = vadd.f32 1.0, %v488_v0 }
 0x10d   :  { %v492_v4 = vpop.eup %491  ;;  %v360_v5 = vadd.f32 1.0, %v490_v2  ;;  %493 = vrcp.f32 %v358_v1 }
 0x10e   :  { %v361_v6 = vadd.f32 1.0, %v492_v4  ;;  %495 = vrcp.f32 %v359_v3 }
 0x10f   :  { %497 = vrcp.f32 %v360_v5 }
 0x110   :  { %499 = vrcp.f32 %v361_v6 }
 0x117   :  { %v494_v7 = vpop.eup %493 }
 0x118   :  { %v496_v8 = vpop.eup %495 }
 0x119   :  { %v498_v9 = vpop.eup %497  ;;  %v374_v10 = vcombine.low %v494_v7, %v496_v8 }
 0x11a   :  { %v500_v11 = vpop.eup %499 }
 0x11b   :  { %v375_v12 = vcombine.low %v498_v9, %v500_v11  ;;  %378 = vst [vmem:[%s646_s3] sm:$0xff] %v374_v10 }
 0x11d   :  { %379 = vst [vmem:[%s646_s3 + $0x8] sm:$0xff] %v375_v12 }

</bundles_post_ra>
